<compile_context>
chip_gen: v5e
topology: v5e:2x2
jax: 0.10.0
libtpu: 0.0.40
codegen_flags: <defaults>
</compile_context>

<pallas_src>
import jax
import jax.numpy as jnp
from jax import lax
from jax.experimental import pallas as pl
from jax.experimental.pallas import tpu as pltpu


# ----------------------------------------------------------------------------
# helpers
# ----------------------------------------------------------------------------
def _round_up(x, m):
    return ((x + m - 1) // m) * m


def _vmem_limit_bytes():
    """Generation-aware VMEM cap with ~25% headroom for double-buffering."""
    try:
        cap = int(pltpu.get_tpu_info().vmem_capacity_bytes)
    except Exception:
        cap = 64 * 1024 * 1024  # conservative v7x fallback
    return max(16 * 1024 * 1024, (cap * 3) // 4)


# ----------------------------------------------------------------------------
# fused kernel: GRU encoder + GRU decoder + attention + combine + classifier
# (one batch element per grid step; everything VMEM-resident)
# ----------------------------------------------------------------------------
def seq2seq_fused_kernel(src_ref, tgt_ref, mask_ref,
                         w_ih_e_ref, w_hh_e_ref, b_ih_e_ref, b_hh_e_ref,
                         w_ih_d_ref, w_hh_d_ref, b_ih_d_ref, b_hh_d_ref,
                         w_ctx_ref, w_hid_ref, b_c_ref,
                         w_cls_ref, b_cls_ref,
                         out_ref,
                         gi_e_scr, gi_d_scr, enc_scr, dec_scr):
    S, H = src_ref.shape
    T = tgt_ref.shape[0]
    H2, H3 = 2 * H, 3 * H

    # ---- fused input->hidden projections: ONE [S,H]@[H,3Hp] matmul per network ----
    gi_e_scr[...] = (jnp.dot(src_ref[...], w_ih_e_ref[...],
                             preferred_element_type=jnp.float32) + b_ih_e_ref[...])
    gi_d_scr[...] = (jnp.dot(tgt_ref[...], w_ih_d_ref[...],
                             preferred_element_type=jnp.float32) + b_ih_d_ref[...])

    # hoist hidden->hidden weights out of the recurrences
    w_hh_e = w_hh_e_ref[...]
    b_hh_e = b_hh_e_ref[...]
    w_hh_d = w_hh_d_ref[...]
    b_hh_d = b_hh_d_ref[...]

    def gru_cell(h, gi, w_hh, b_hh):
        # single fused [1,H]@[H,3Hp] hidden->hidden matmul; PyTorch gate order (r, z, n)
        gh = jnp.dot(h.astype(jnp.bfloat16), w_hh,
                     preferred_element_type=jnp.float32) + b_hh
        r = jax.nn.sigmoid(gi[:, 0:H] + gh[:, 0:H])
        z = jax.nn.sigmoid(gi[:, H:H2] + gh[:, H:H2])
        n = jnp.tanh(gi[:, H2:H3] + r * gh[:, H2:H3])
        return (1.0 - z) * n + z * h

    # ---------------- encoder recurrence ----------------
    def enc_body(s, h):
        h_new = gru_cell(h, gi_e_scr[pl.ds(s, 1), :], w_hh_e, b_hh_e)
        enc_scr[pl.ds(s, 1), :] = h_new
        return h_new

    h_enc = lax.fori_loop(0, S, enc_body, jnp.zeros((1, H), jnp.float32),
                          unroll=min(8, S))

    # ---------------- decoder recurrence (init = encoder final state) ----------------
    def dec_body(t, h):
        h_new = gru_cell(h, gi_d_scr[pl.ds(t, 1), :], w_hh_d, b_hh_d)
        dec_scr[pl.ds(t, 1), :] = h_new
        return h_new

    lax.fori_loop(0, T, dec_body, h_enc, unroll=min(8, T))

    # ---------------- Luong dot attention + tanh combine + classifier ----------------
    enc = enc_scr[...].astype(jnp.bfloat16)     # [S, H]
    dec = dec_scr[...].astype(jnp.bfloat16)     # [T, H]

    # TODO(synk): at realistic S, emit enc pre-transposed to avoid the rhs-minor-dim
    # contraction (per-step XLU transpose on v6e/v7x); negligible at S=8.
    scores = lax.dot_general(dec, enc, (((1,), (1,)), ((), ())),
                             preferred_element_type=jnp.float32)       # [T, S]
    scores = scores + mask_ref[...]                                    # [1, S] additive mask

    m = jnp.max(scores, axis=-1, keepdims=True)
    e = jnp.exp(scores - m)
    attn = e * pl.reciprocal(jnp.sum(e, axis=-1, keepdims=True), approx=True)

    ctx = jnp.dot(attn.astype(jnp.bfloat16), enc,
                  preferred_element_type=jnp.float32)                  # [T, H]

    comb = jnp.tanh(
        jnp.dot(ctx.astype(jnp.bfloat16), w_ctx_ref[...],
                preferred_element_type=jnp.float32)
        + jnp.dot(dec, w_hid_ref[...], preferred_element_type=jnp.float32)
        + b_c_ref[...])                                                # [T, H] f32

    # classifier: lane-dense (V padded to a multiple of 128) output
    out_ref[...] = (jnp.dot(comb.astype(jnp.bfloat16), w_cls_ref[...],
                            preferred_element_type=jnp.float32)
                    + b_cls_ref[...])                                  # [T, Vp] f32


# ----------------------------------------------------------------------------
# parameters + forward wrapper
# ----------------------------------------------------------------------------
def init_params(key, src_v, tgt_v, H):
    """Weights stored directly in the kernel layout:
       GRU weights [H, 3H] (x @ W convention, gate order r,z,n) padded to [H, 3Hp];
       classifier weight padded to [H, Vp]; everything matmul-facing in bf16."""
    G = _round_up(3 * H, 128)
    Vp = _round_up(tgt_v, 128)
    ks = jax.random.split(key, 10)
    s = 0.1

    def gate_w(k):
        w = s * jax.random.normal(k, (H, 3 * H), jnp.float32)
        return jnp.pad(w, ((0, 0), (0, G - 3 * H))).astype(jnp.bfloat16)

    w_cls = s * jax.random.normal(ks[8], (H, tgt_v), jnp.float32)
    w_cls = jnp.pad(w_cls, ((0, 0), (0, Vp - tgt_v))).astype(jnp.bfloat16)

    return {
        "src_emb": (s * jax.random.normal(ks[0], (src_v, H), jnp.float32)).astype(jnp.bfloat16),
        "tgt_emb": (s * jax.random.normal(ks[1], (tgt_v, H), jnp.float32)).astype(jnp.bfloat16),
        "w_ih_e": gate_w(ks[2]),
        "w_hh_e": gate_w(ks[3]),
        "b_ih_e": jnp.zeros((1, G), jnp.float32),
        "b_hh_e": jnp.zeros((1, G), jnp.float32),
        "w_ih_d": gate_w(ks[4]),
        "w_hh_d": gate_w(ks[5]),
        "b_ih_d": jnp.zeros((1, G), jnp.float32),
        "b_hh_d": jnp.zeros((1, G), jnp.float32),
        "w_c_ctx": (s * jax.random.normal(ks[6], (H, H), jnp.float32)).astype(jnp.bfloat16),
        "w_c_hid": (s * jax.random.normal(ks[7], (H, H), jnp.float32)).astype(jnp.bfloat16),
        "b_c": jnp.zeros((1, H), jnp.float32),
        "w_cls": w_cls,
        "b_cls": jnp.zeros((1, Vp), jnp.float32),
    }


def translation_forward(params, src_input, tgt_input, src_key_padding_mask=None, *, tgt_v):
    """src_input [B, S] int32, tgt_input [B, T] int32,
       src_key_padding_mask [B, S] bool (True = padding).  Returns logits [B, T, tgt_v]."""
    B, S = src_input.shape
    T = tgt_input.shape[1]
    H = params["src_emb"].shape[1]
    G = params["w_ih_e"].shape[1]
    Vp = params["w_cls"].shape[1]

    # Embedding gathers stay in JAX glue (pure gather); tables are already bf16.
    # TODO(synk): move the gathers into the kernel via scalar-prefetch if they ever dominate.
    src_emb = jnp.take(params["src_emb"], src_input, axis=0)   # [B, S, H] bf16
    tgt_emb = jnp.take(params["tgt_emb"], tgt_input, axis=0)   # [B, T, H] bf16

    if src_key_padding_mask is None:
        add_mask = jnp.zeros((B, 1, S), jnp.float32)
    else:
        add_mask = jnp.where(src_key_padding_mask, -1e9, 0.0).astype(jnp.float32)[:, None, :]

    const2 = lambda shape: pl.BlockSpec(shape, lambda b: (0, 0))

    logits_p = pl.pallas_call(
        seq2seq_fused_kernel,
        out_shape=jax.ShapeDtypeStruct((B, T, Vp), jnp.float32),
        grid=(B,),
        in_specs=[
            pl.BlockSpec((None, S, H), lambda b: (b, 0, 0)),   # src_emb
            pl.BlockSpec((None, T, H), lambda b: (b, 0, 0)),   # tgt_emb
            pl.BlockSpec((None, 1, S), lambda b: (b, 0, 0)),   # additive mask
            const2((H, G)), const2((H, G)), const2((1, G)), const2((1, G)),   # encoder GRU
            const2((H, G)), const2((H, G)), const2((1, G)), const2((1, G)),   # decoder GRU
            const2((H, H)), const2((H, H)), const2((1, H)),                   # combine
            const2((H, Vp)), const2((1, Vp)),                                 # classifier
        ],
        out_specs=pl.BlockSpec((None, T, Vp), lambda b: (b, 0, 0)),
        scratch_shapes=[
            pltpu.VMEM((S, G), jnp.float32),    # fused encoder input->hidden gates (r|z|n)
            pltpu.VMEM((T, G), jnp.float32),    # fused decoder input->hidden gates (r|z|n)
            pltpu.VMEM((S, H), jnp.float32),    # encoder hidden states
            pltpu.VMEM((T, H), jnp.float32),    # decoder hidden states
        ],
        compiler_params=pltpu.CompilerParams(
            dimension_semantics=("parallel",),
            vmem_limit_bytes=int(_vmem_limit_bytes()),
        ),
    )(src_emb, tgt_emb, add_mask,
      params["w_ih_e"], params["w_hh_e"], params["b_ih_e"], params["b_hh_e"],
      params["w_ih_d"], params["w_hh_d"], params["b_ih_d"], params["b_hh_d"],
      params["w_c_ctx"], params["w_c_hid"], params["b_c"],
      params["w_cls"], params["b_cls"])

    # drop the lane-padding columns of the classifier (padded weights/bias are zero)
    return logits_p[..., :tgt_v]


if __name__ == "__main__":
    # shapes consistent with the module's forward:
    # src_input [B, src_len], tgt_input [B, tgt_len], hidden_size=32, tgt_v_size=64
    B, S, T, H = 2, 8, 8, 32
    SRC_V, TGT_V = 50, 64

    key = jax.random.PRNGKey(0)
    k_p, k_src, k_tgt = jax.random.split(key, 3)
    params = init_params(k_p, SRC_V, TGT_V, H)

    src_input = jax.random.randint(k_src, (B, S), 0, SRC_V, dtype=jnp.int32)
    tgt_input = jax.random.randint(k_tgt, (B, T), 0, TGT_V, dtype=jnp.int32)
    # last two src positions of batch element 1 are padding
    src_key_padding_mask = jnp.zeros((B, S), dtype=bool).at[1, -2:].set(True)

    logits = translation_forward(params, src_input, tgt_input, src_key_padding_mask,
                                 tgt_v=TGT_V)
    logits = jax.block_until_ready(logits)

    assert logits.shape == (B, T, TGT_V), logits.shape
    assert bool(jnp.all(jnp.isfinite(logits)))
    print("KERNEL_OK")
</pallas_src>

<mosaic_0001>
module attributes {stable_mosaic.version = 11 : i64} {
  func.func @seq2seq_fused_kernel(%arg0: i32, %arg1: memref<1x8x32xbf16, #tpu.memory_space<vmem>>, %arg2: memref<1x8x32xbf16, #tpu.memory_space<vmem>>, %arg3: memref<1x1x8xf32, #tpu.memory_space<vmem>>, %arg4: memref<32x128xbf16, #tpu.memory_space<vmem>>, %arg5: memref<32x128xbf16, #tpu.memory_space<vmem>>, %arg6: memref<1x128xf32, #tpu.memory_space<vmem>>, %arg7: memref<1x128xf32, #tpu.memory_space<vmem>>, %arg8: memref<32x128xbf16, #tpu.memory_space<vmem>>, %arg9: memref<32x128xbf16, #tpu.memory_space<vmem>>, %arg10: memref<1x128xf32, #tpu.memory_space<vmem>>, %arg11: memref<1x128xf32, #tpu.memory_space<vmem>>, %arg12: memref<32x32xbf16, #tpu.memory_space<vmem>>, %arg13: memref<32x32xbf16, #tpu.memory_space<vmem>>, %arg14: memref<1x32xf32, #tpu.memory_space<vmem>>, %arg15: memref<32x128xbf16, #tpu.memory_space<vmem>>, %arg16: memref<1x128xf32, #tpu.memory_space<vmem>>, %arg17: memref<1x8x128xf32, #tpu.memory_space<vmem>>, %arg18: memref<8x128xf32, #tpu.memory_space<vmem>>, %arg19: memref<8x128xf32, #tpu.memory_space<vmem>>, %arg20: memref<8x32xf32, #tpu.memory_space<vmem>>, %arg21: memref<8x32xf32, #tpu.memory_space<vmem>>) attributes {dimension_semantics = [#tpu.dimension_semantics<parallel>], iteration_bounds = array<i64: 2>, scalar_prefetch = 0 : i64, scratch_operands = 4 : i64, tpu.core_type = #tpu.core_type<tc>, window_params = [{transform_indices = @transform_0, window_bounds = array<i64: 1, 8, 32>}, {transform_indices = @transform_1, window_bounds = array<i64: 1, 8, 32>}, {transform_indices = @transform_2, window_bounds = array<i64: 1, 1, 8>}, {pipeline_mode = #tpu.pipeline_mode<synchronous>, transform_indices = @transform_3, window_bounds = array<i64: 32, 128>}, {pipeline_mode = #tpu.pipeline_mode<synchronous>, transform_indices = @transform_4, window_bounds = array<i64: 32, 128>}, {pipeline_mode = #tpu.pipeline_mode<synchronous>, transform_indices = @transform_5, window_bounds = array<i64: 1, 128>}, {pipeline_mode = #tpu.pipeline_mode<synchronous>, transform_indices = @transform_6, window_bounds = array<i64: 1, 128>}, {pipeline_mode = #tpu.pipeline_mode<synchronous>, transform_indices = @transform_7, window_bounds = array<i64: 32, 128>}, {pipeline_mode = #tpu.pipeline_mode<synchronous>, transform_indices = @transform_8, window_bounds = array<i64: 32, 128>}, {pipeline_mode = #tpu.pipeline_mode<synchronous>, transform_indices = @transform_9, window_bounds = array<i64: 1, 128>}, {pipeline_mode = #tpu.pipeline_mode<synchronous>, transform_indices = @transform_10, window_bounds = array<i64: 1, 128>}, {pipeline_mode = #tpu.pipeline_mode<synchronous>, transform_indices = @transform_11, window_bounds = array<i64: 32, 32>}, {pipeline_mode = #tpu.pipeline_mode<synchronous>, transform_indices = @transform_12, window_bounds = array<i64: 32, 32>}, {pipeline_mode = #tpu.pipeline_mode<synchronous>, transform_indices = @transform_13, window_bounds = array<i64: 1, 32>}, {pipeline_mode = #tpu.pipeline_mode<synchronous>, transform_indices = @transform_14, window_bounds = array<i64: 32, 128>}, {pipeline_mode = #tpu.pipeline_mode<synchronous>, transform_indices = @transform_15, window_bounds = array<i64: 1, 128>}, {transform_indices = @transform_16, window_bounds = array<i64: 1, 8, 128>}]} {
    %c0 = arith.constant 0 : index
    %c0_0 = arith.constant 0 : index
    %c0_1 = arith.constant 0 : index
    %0 = vector.load %arg1[%c0, %c0_0, %c0_1] : memref<1x8x32xbf16, #tpu.memory_space<vmem>>, vector<1x8x32xbf16>
    %1 = vector.shape_cast %0 : vector<1x8x32xbf16> to vector<8x32xbf16>
    %c0_2 = arith.constant 0 : index
    %c0_3 = arith.constant 0 : index
    %2 = vector.load %arg4[%c0_2, %c0_3] : memref<32x128xbf16, #tpu.memory_space<vmem>>, vector<32x128xbf16>
    %cst = arith.constant dense<0.000000e+00> : vector<8x128xf32>
    %3 = tpu.matmul %1, %2, %cst {dimension_numbers = #tpu.dot_dimension_numbers<[1], [0], [0], [1], [0, 0, 1, 1], [], []>} : vector<8x32xbf16>, vector<32x128xbf16>, vector<8x128xf32> -> vector<8x128xf32>
    %c0_4 = arith.constant 0 : index
    %c0_5 = arith.constant 0 : index
    %4 = vector.load %arg6[%c0_4, %c0_5] : memref<1x128xf32, #tpu.memory_space<vmem>>, vector<1x128xf32>
    %5 = vector.broadcast %4 : vector<1x128xf32> to vector<8x128xf32>
    %6 = arith.addf %3, %5 : vector<8x128xf32>
    %c0_6 = arith.constant 0 : index
    %c0_7 = arith.constant 0 : index
    %7 = vector.load %arg18[%c0_6, %c0_7] : memref<8x128xf32, #tpu.memory_space<vmem>>, vector<8x128xf32>
    tpu.vector_store %arg18[%c0_6, %c0_7], %6 {strides = array<i32>} : memref<8x128xf32, #tpu.memory_space<vmem>>, vector<8x128xf32>,
    %c0_8 = arith.constant 0 : index
    %c0_9 = arith.constant 0 : index
    %c0_10 = arith.constant 0 : index
    %8 = vector.load %arg2[%c0_8, %c0_9, %c0_10] : memref<1x8x32xbf16, #tpu.memory_space<vmem>>, vector<1x8x32xbf16>
    %9 = vector.shape_cast %8 : vector<1x8x32xbf16> to vector<8x32xbf16>
    %c0_11 = arith.constant 0 : index
    %c0_12 = arith.constant 0 : index
    %10 = vector.load %arg8[%c0_11, %c0_12] : memref<32x128xbf16, #tpu.memory_space<vmem>>, vector<32x128xbf16>
    %cst_13 = arith.constant dense<0.000000e+00> : vector<8x128xf32>
    %11 = tpu.matmul %9, %10, %cst_13 {dimension_numbers = #tpu.dot_dimension_numbers<[1], [0], [0], [1], [0, 0, 1, 1], [], []>} : vector<8x32xbf16>, vector<32x128xbf16>, vector<8x128xf32> -> vector<8x128xf32>
    %c0_14 = arith.constant 0 : index
    %c0_15 = arith.constant 0 : index
    %12 = vector.load %arg10[%c0_14, %c0_15] : memref<1x128xf32, #tpu.memory_space<vmem>>, vector<1x128xf32>
    %13 = vector.broadcast %12 : vector<1x128xf32> to vector<8x128xf32>
    %14 = arith.addf %11, %13 : vector<8x128xf32>
    %c0_16 = arith.constant 0 : index
    %c0_17 = arith.constant 0 : index
    %15 = vector.load %arg19[%c0_16, %c0_17] : memref<8x128xf32, #tpu.memory_space<vmem>>, vector<8x128xf32>
    tpu.vector_store %arg19[%c0_16, %c0_17], %14 {strides = array<i32>} : memref<8x128xf32, #tpu.memory_space<vmem>>, vector<8x128xf32>,
    %c0_18 = arith.constant 0 : index
    %c0_19 = arith.constant 0 : index
    %16 = vector.load %arg5[%c0_18, %c0_19] : memref<32x128xbf16, #tpu.memory_space<vmem>>, vector<32x128xbf16>
    %c0_20 = arith.constant 0 : index
    %c0_21 = arith.constant 0 : index
    %17 = vector.load %arg7[%c0_20, %c0_21] : memref<1x128xf32, #tpu.memory_space<vmem>>, vector<1x128xf32>
    %c0_22 = arith.constant 0 : index
    %c0_23 = arith.constant 0 : index
    %18 = vector.load %arg9[%c0_22, %c0_23] : memref<32x128xbf16, #tpu.memory_space<vmem>>, vector<32x128xbf16>
    %c0_24 = arith.constant 0 : index
    %c0_25 = arith.constant 0 : index
    %19 = vector.load %arg11[%c0_24, %c0_25] : memref<1x128xf32, #tpu.memory_space<vmem>>, vector<1x128xf32>
    %cst_26 = arith.constant 0.000000e+00 : f32
    %20 = vector.broadcast %cst_26 : f32 to vector<1x32xf32>
    %c0_i32 = arith.constant 0 : i32
    %21 = arith.index_cast %c0_i32 : i32 to index
    %c0_27 = arith.constant 0 : index
    %22 = vector.load %arg18[%21, %c0_27] : memref<8x128xf32, #tpu.memory_space<vmem>>, vector<1x128xf32>
    %23 = arith.truncf %20 : vector<1x32xf32> to vector<1x32xbf16>
    %cst_28 = arith.constant dense<0.000000e+00> : vector<1x128xf32>
    %24 = tpu.matmul %23, %16, %cst_28 {dimension_numbers = #tpu.dot_dimension_numbers<[1], [0], [0], [1], [0, 0, 1, 1], [], []>} : vector<1x32xbf16>, vector<32x128xbf16>, vector<1x128xf32> -> vector<1x128xf32>
    %25 = arith.addf %24, %17 : vector<1x128xf32>
    %26 = vector.extract_strided_slice %22 {offsets = [0, 0], sizes = [1, 32], strides = [1, 1]} : vector<1x128xf32> to vector<1x32xf32>
    %27 = vector.extract_strided_slice %25 {offsets = [0, 0], sizes = [1, 32], strides = [1, 1]} : vector<1x128xf32> to vector<1x32xf32>
    %28 = arith.addf %26, %27 : vector<1x32xf32>
    %29 = arith.negf %28 : vector<1x32xf32>
    %30 = math.exp %29 : vector<1x32xf32>
    %cst_29 = arith.constant 1.000000e+00 : f32
    %31 = vector.broadcast %cst_29 : f32 to vector<1x32xf32>
    %32 = arith.addf %31, %30 : vector<1x32xf32>
    %33 = arith.divf %31, %32 : vector<1x32xf32>
    %34 = vector.extract_strided_slice %22 {offsets = [0, 32], sizes = [1, 32], strides = [1, 1]} : vector<1x128xf32> to vector<1x32xf32>
    %35 = vector.extract_strided_slice %25 {offsets = [0, 32], sizes = [1, 32], strides = [1, 1]} : vector<1x128xf32> to vector<1x32xf32>
    %36 = arith.addf %34, %35 : vector<1x32xf32>
    %37 = arith.negf %36 : vector<1x32xf32>
    %38 = math.exp %37 : vector<1x32xf32>
    %cst_30 = arith.constant 1.000000e+00 : f32
    %39 = vector.broadcast %cst_30 : f32 to vector<1x32xf32>
    %40 = arith.addf %39, %38 : vector<1x32xf32>
    %41 = arith.divf %39, %40 : vector<1x32xf32>
    %42 = vector.extract_strided_slice %22 {offsets = [0, 64], sizes = [1, 32], strides = [1, 1]} : vector<1x128xf32> to vector<1x32xf32>
    %43 = vector.extract_strided_slice %25 {offsets = [0, 64], sizes = [1, 32], strides = [1, 1]} : vector<1x128xf32> to vector<1x32xf32>
    %44 = arith.mulf %33, %43 : vector<1x32xf32>
    %45 = arith.addf %42, %44 : vector<1x32xf32>
    %46 = math.tanh %45 : vector<1x32xf32>
    %cst_31 = arith.constant 1.000000e+00 : f32
    %47 = vector.broadcast %cst_31 : f32 to vector<1x32xf32>
    %48 = arith.subf %47, %41 : vector<1x32xf32>
    %49 = arith.mulf %48, %46 : vector<1x32xf32>
    %50 = arith.mulf %41, %20 : vector<1x32xf32>
    %51 = arith.addf %49, %50 : vector<1x32xf32>
    %52 = arith.index_cast %c0_i32 : i32 to index
    %c0_32 = arith.constant 0 : index
    %53 = vector.load %arg20[%52, %c0_32] : memref<8x32xf32, #tpu.memory_space<vmem>>, vector<1x32xf32>
    tpu.vector_store %arg20[%52, %c0_32], %51 {strides = array<i32>} : memref<8x32xf32, #tpu.memory_space<vmem>>, vector<1x32xf32>,
    %c1_i32 = arith.constant 1 : i32
    %54 = arith.index_cast %c1_i32 : i32 to index
    %c0_33 = arith.constant 0 : index
    %55 = vector.load %arg18[%54, %c0_33] : memref<8x128xf32, #tpu.memory_space<vmem>>, vector<1x128xf32>
    %56 = arith.truncf %51 : vector<1x32xf32> to vector<1x32xbf16>
    %cst_34 = arith.constant dense<0.000000e+00> : vector<1x128xf32>
    %57 = tpu.matmul %56, %16, %cst_34 {dimension_numbers = #tpu.dot_dimension_numbers<[1], [0], [0], [1], [0, 0, 1, 1], [], []>} : vector<1x32xbf16>, vector<32x128xbf16>, vector<1x128xf32> -> vector<1x128xf32>
    %58 = arith.addf %57, %17 : vector<1x128xf32>
    %59 = vector.extract_strided_slice %55 {offsets = [0, 0], sizes = [1, 32], strides = [1, 1]} : vector<1x128xf32> to vector<1x32xf32>
    %60 = vector.extract_strided_slice %58 {offsets = [0, 0], sizes = [1, 32], strides = [1, 1]} : vector<1x128xf32> to vector<1x32xf32>
    %61 = arith.addf %59, %60 : vector<1x32xf32>
    %62 = arith.negf %61 : vector<1x32xf32>
    %63 = math.exp %62 : vector<1x32xf32>
    %cst_35 = arith.constant 1.000000e+00 : f32
    %64 = vector.broadcast %cst_35 : f32 to vector<1x32xf32>
    %65 = arith.addf %64, %63 : vector<1x32xf32>
    %66 = arith.divf %64, %65 : vector<1x32xf32>
    %67 = vector.extract_strided_slice %55 {offsets = [0, 32], sizes = [1, 32], strides = [1, 1]} : vector<1x128xf32> to vector<1x32xf32>
    %68 = vector.extract_strided_slice %58 {offsets = [0, 32], sizes = [1, 32], strides = [1, 1]} : vector<1x128xf32> to vector<1x32xf32>
    %69 = arith.addf %67, %68 : vector<1x32xf32>
    %70 = arith.negf %69 : vector<1x32xf32>
    %71 = math.exp %70 : vector<1x32xf32>
    %cst_36 = arith.constant 1.000000e+00 : f32
    %72 = vector.broadcast %cst_36 : f32 to vector<1x32xf32>
    %73 = arith.addf %72, %71 : vector<1x32xf32>
    %74 = arith.divf %72, %73 : vector<1x32xf32>
    %75 = vector.extract_strided_slice %55 {offsets = [0, 64], sizes = [1, 32], strides = [1, 1]} : vector<1x128xf32> to vector<1x32xf32>
    %76 = vector.extract_strided_slice %58 {offsets = [0, 64], sizes = [1, 32], strides = [1, 1]} : vector<1x128xf32> to vector<1x32xf32>
    %77 = arith.mulf %66, %76 : vector<1x32xf32>
    %78 = arith.addf %75, %77 : vector<1x32xf32>
    %79 = math.tanh %78 : vector<1x32xf32>
    %cst_37 = arith.constant 1.000000e+00 : f32
    %80 = vector.broadcast %cst_37 : f32 to vector<1x32xf32>
    %81 = arith.subf %80, %74 : vector<1x32xf32>
    %82 = arith.mulf %81, %79 : vector<1x32xf32>
    %83 = arith.mulf %74, %51 : vector<1x32xf32>
    %84 = arith.addf %82, %83 : vector<1x32xf32>
    %85 = arith.index_cast %c1_i32 : i32 to index
    %c0_38 = arith.constant 0 : index
    %86 = vector.load %arg20[%85, %c0_38] : memref<8x32xf32, #tpu.memory_space<vmem>>, vector<1x32xf32>
    tpu.vector_store %arg20[%85, %c0_38], %84 {strides = array<i32>} : memref<8x32xf32, #tpu.memory_space<vmem>>, vector<1x32xf32>,
    %c2_i32 = arith.constant 2 : i32
    %87 = arith.index_cast %c2_i32 : i32 to index
    %c0_39 = arith.constant 0 : index
    %88 = vector.load %arg18[%87, %c0_39] : memref<8x128xf32, #tpu.memory_space<vmem>>, vector<1x128xf32>
    %89 = arith.truncf %84 : vector<1x32xf32> to vector<1x32xbf16>
    %cst_40 = arith.constant dense<0.000000e+00> : vector<1x128xf32>
    %90 = tpu.matmul %89, %16, %cst_40 {dimension_numbers = #tpu.dot_dimension_numbers<[1], [0], [0], [1], [0, 0, 1, 1], [], []>} : vector<1x32xbf16>, vector<32x128xbf16>, vector<1x128xf32> -> vector<1x128xf32>
    %91 = arith.addf %90, %17 : vector<1x128xf32>
    %92 = vector.extract_strided_slice %88 {offsets = [0, 0], sizes = [1, 32], strides = [1, 1]} : vector<1x128xf32> to vector<1x32xf32>
    %93 = vector.extract_strided_slice %91 {offsets = [0, 0], sizes = [1, 32], strides = [1, 1]} : vector<1x128xf32> to vector<1x32xf32>
    %94 = arith.addf %92, %93 : vector<1x32xf32>
    %95 = arith.negf %94 : vector<1x32xf32>
    %96 = math.exp %95 : vector<1x32xf32>
    %cst_41 = arith.constant 1.000000e+00 : f32
    %97 = vector.broadcast %cst_41 : f32 to vector<1x32xf32>
    %98 = arith.addf %97, %96 : vector<1x32xf32>
    %99 = arith.divf %97, %98 : vector<1x32xf32>
    %100 = vector.extract_strided_slice %88 {offsets = [0, 32], sizes = [1, 32], strides = [1, 1]} : vector<1x128xf32> to vector<1x32xf32>
    %101 = vector.extract_strided_slice %91 {offsets = [0, 32], sizes = [1, 32], strides = [1, 1]} : vector<1x128xf32> to vector<1x32xf32>
    %102 = arith.addf %100, %101 : vector<1x32xf32>
    %103 = arith.negf %102 : vector<1x32xf32>
    %104 = math.exp %103 : vector<1x32xf32>
    %cst_42 = arith.constant 1.000000e+00 : f32
    %105 = vector.broadcast %cst_42 : f32 to vector<1x32xf32>
    %106 = arith.addf %105, %104 : vector<1x32xf32>
    %107 = arith.divf %105, %106 : vector<1x32xf32>
    %108 = vector.extract_strided_slice %88 {offsets = [0, 64], sizes = [1, 32], strides = [1, 1]} : vector<1x128xf32> to vector<1x32xf32>
    %109 = vector.extract_strided_slice %91 {offsets = [0, 64], sizes = [1, 32], strides = [1, 1]} : vector<1x128xf32> to vector<1x32xf32>
    %110 = arith.mulf %99, %109 : vector<1x32xf32>
    %111 = arith.addf %108, %110 : vector<1x32xf32>
    %112 = math.tanh %111 : vector<1x32xf32>
    %cst_43 = arith.constant 1.000000e+00 : f32
    %113 = vector.broadcast %cst_43 : f32 to vector<1x32xf32>
    %114 = arith.subf %113, %107 : vector<1x32xf32>
    %115 = arith.mulf %114, %112 : vector<1x32xf32>
    %116 = arith.mulf %107, %84 : vector<1x32xf32>
    %117 = arith.addf %115, %116 : vector<1x32xf32>
    %118 = arith.index_cast %c2_i32 : i32 to index
    %c0_44 = arith.constant 0 : index
    %119 = vector.load %arg20[%118, %c0_44] : memref<8x32xf32, #tpu.memory_space<vmem>>, vector<1x32xf32>
    tpu.vector_store %arg20[%118, %c0_44], %117 {strides = array<i32>} : memref<8x32xf32, #tpu.memory_space<vmem>>, vector<1x32xf32>,
    %c3_i32 = arith.constant 3 : i32
    %120 = arith.index_cast %c3_i32 : i32 to index
    %c0_45 = arith.constant 0 : index
    %121 = vector.load %arg18[%120, %c0_45] : memref<8x128xf32, #tpu.memory_space<vmem>>, vector<1x128xf32>
    %122 = arith.truncf %117 : vector<1x32xf32> to vector<1x32xbf16>
    %cst_46 = arith.constant dense<0.000000e+00> : vector<1x128xf32>
    %123 = tpu.matmul %122, %16, %cst_46 {dimension_numbers = #tpu.dot_dimension_numbers<[1], [0], [0], [1], [0, 0, 1, 1], [], []>} : vector<1x32xbf16>, vector<32x128xbf16>, vector<1x128xf32> -> vector<1x128xf32>
    %124 = arith.addf %123, %17 : vector<1x128xf32>
    %125 = vector.extract_strided_slice %121 {offsets = [0, 0], sizes = [1, 32], strides = [1, 1]} : vector<1x128xf32> to vector<1x32xf32>
    %126 = vector.extract_strided_slice %124 {offsets = [0, 0], sizes = [1, 32], strides = [1, 1]} : vector<1x128xf32> to vector<1x32xf32>
    %127 = arith.addf %125, %126 : vector<1x32xf32>
    %128 = arith.negf %127 : vector<1x32xf32>
    %129 = math.exp %128 : vector<1x32xf32>
    %cst_47 = arith.constant 1.000000e+00 : f32
    %130 = vector.broadcast %cst_47 : f32 to vector<1x32xf32>
    %131 = arith.addf %130, %129 : vector<1x32xf32>
    %132 = arith.divf %130, %131 : vector<1x32xf32>
    %133 = vector.extract_strided_slice %121 {offsets = [0, 32], sizes = [1, 32], strides = [1, 1]} : vector<1x128xf32> to vector<1x32xf32>
    %134 = vector.extract_strided_slice %124 {offsets = [0, 32], sizes = [1, 32], strides = [1, 1]} : vector<1x128xf32> to vector<1x32xf32>
    %135 = arith.addf %133, %134 : vector<1x32xf32>
    %136 = arith.negf %135 : vector<1x32xf32>
    %137 = math.exp %136 : vector<1x32xf32>
    %cst_48 = arith.constant 1.000000e+00 : f32
    %138 = vector.broadcast %cst_48 : f32 to vector<1x32xf32>
    %139 = arith.addf %138, %137 : vector<1x32xf32>
    %140 = arith.divf %138, %139 : vector<1x32xf32>
    %141 = vector.extract_strided_slice %121 {offsets = [0, 64], sizes = [1, 32], strides = [1, 1]} : vector<1x128xf32> to vector<1x32xf32>
    %142 = vector.extract_strided_slice %124 {offsets = [0, 64], sizes = [1, 32], strides = [1, 1]} : vector<1x128xf32> to vector<1x32xf32>
    %143 = arith.mulf %132, %142 : vector<1x32xf32>
    %144 = arith.addf %141, %143 : vector<1x32xf32>
    %145 = math.tanh %144 : vector<1x32xf32>
    %cst_49 = arith.constant 1.000000e+00 : f32
    %146 = vector.broadcast %cst_49 : f32 to vector<1x32xf32>
    %147 = arith.subf %146, %140 : vector<1x32xf32>
    %148 = arith.mulf %147, %145 : vector<1x32xf32>
    %149 = arith.mulf %140, %117 : vector<1x32xf32>
    %150 = arith.addf %148, %149 : vector<1x32xf32>
    %151 = arith.index_cast %c3_i32 : i32 to index
    %c0_50 = arith.constant 0 : index
    %152 = vector.load %arg20[%151, %c0_50] : memref<8x32xf32, #tpu.memory_space<vmem>>, vector<1x32xf32>
    tpu.vector_store %arg20[%151, %c0_50], %150 {strides = array<i32>} : memref<8x32xf32, #tpu.memory_space<vmem>>, vector<1x32xf32>,
    %c4_i32 = arith.constant 4 : i32
    %153 = arith.index_cast %c4_i32 : i32 to index
    %c0_51 = arith.constant 0 : index
    %154 = vector.load %arg18[%153, %c0_51] : memref<8x128xf32, #tpu.memory_space<vmem>>, vector<1x128xf32>
    %155 = arith.truncf %150 : vector<1x32xf32> to vector<1x32xbf16>
    %cst_52 = arith.constant dense<0.000000e+00> : vector<1x128xf32>
    %156 = tpu.matmul %155, %16, %cst_52 {dimension_numbers = #tpu.dot_dimension_numbers<[1], [0], [0], [1], [0, 0, 1, 1], [], []>} : vector<1x32xbf16>, vector<32x128xbf16>, vector<1x128xf32> -> vector<1x128xf32>
    %157 = arith.addf %156, %17 : vector<1x128xf32>
    %158 = vector.extract_strided_slice %154 {offsets = [0, 0], sizes = [1, 32], strides = [1, 1]} : vector<1x128xf32> to vector<1x32xf32>
    %159 = vector.extract_strided_slice %157 {offsets = [0, 0], sizes = [1, 32], strides = [1, 1]} : vector<1x128xf32> to vector<1x32xf32>
    %160 = arith.addf %158, %159 : vector<1x32xf32>
    %161 = arith.negf %160 : vector<1x32xf32>
    %162 = math.exp %161 : vector<1x32xf32>
    %cst_53 = arith.constant 1.000000e+00 : f32
    %163 = vector.broadcast %cst_53 : f32 to vector<1x32xf32>
    %164 = arith.addf %163, %162 : vector<1x32xf32>
    %165 = arith.divf %163, %164 : vector<1x32xf32>
    %166 = vector.extract_strided_slice %154 {offsets = [0, 32], sizes = [1, 32], strides = [1, 1]} : vector<1x128xf32> to vector<1x32xf32>
    %167 = vector.extract_strided_slice %157 {offsets = [0, 32], sizes = [1, 32], strides = [1, 1]} : vector<1x128xf32> to vector<1x32xf32>
    %168 = arith.addf %166, %167 : vector<1x32xf32>
    %169 = arith.negf %168 : vector<1x32xf32>
    %170 = math.exp %169 : vector<1x32xf32>
    %cst_54 = arith.constant 1.000000e+00 : f32
    %171 = vector.broadcast %cst_54 : f32 to vector<1x32xf32>
    %172 = arith.addf %171, %170 : vector<1x32xf32>
    %173 = arith.divf %171, %172 : vector<1x32xf32>
    %174 = vector.extract_strided_slice %154 {offsets = [0, 64], sizes = [1, 32], strides = [1, 1]} : vector<1x128xf32> to vector<1x32xf32>
    %175 = vector.extract_strided_slice %157 {offsets = [0, 64], sizes = [1, 32], strides = [1, 1]} : vector<1x128xf32> to vector<1x32xf32>
    %176 = arith.mulf %165, %175 : vector<1x32xf32>
    %177 = arith.addf %174, %176 : vector<1x32xf32>
    %178 = math.tanh %177 : vector<1x32xf32>
    %cst_55 = arith.constant 1.000000e+00 : f32
    %179 = vector.broadcast %cst_55 : f32 to vector<1x32xf32>
    %180 = arith.subf %179, %173 : vector<1x32xf32>
    %181 = arith.mulf %180, %178 : vector<1x32xf32>
    %182 = arith.mulf %173, %150 : vector<1x32xf32>
    %183 = arith.addf %181, %182 : vector<1x32xf32>
    %184 = arith.index_cast %c4_i32 : i32 to index
    %c0_56 = arith.constant 0 : index
    %185 = vector.load %arg20[%184, %c0_56] : memref<8x32xf32, #tpu.memory_space<vmem>>, vector<1x32xf32>
    tpu.vector_store %arg20[%184, %c0_56], %183 {strides = array<i32>} : memref<8x32xf32, #tpu.memory_space<vmem>>, vector<1x32xf32>,
    %c5_i32 = arith.constant 5 : i32
    %186 = arith.index_cast %c5_i32 : i32 to index
    %c0_57 = arith.constant 0 : index
    %187 = vector.load %arg18[%186, %c0_57] : memref<8x128xf32, #tpu.memory_space<vmem>>, vector<1x128xf32>
    %188 = arith.truncf %183 : vector<1x32xf32> to vector<1x32xbf16>
    %cst_58 = arith.constant dense<0.000000e+00> : vector<1x128xf32>
    %189 = tpu.matmul %188, %16, %cst_58 {dimension_numbers = #tpu.dot_dimension_numbers<[1], [0], [0], [1], [0, 0, 1, 1], [], []>} : vector<1x32xbf16>, vector<32x128xbf16>, vector<1x128xf32> -> vector<1x128xf32>
    %190 = arith.addf %189, %17 : vector<1x128xf32>
    %191 = vector.extract_strided_slice %187 {offsets = [0, 0], sizes = [1, 32], strides = [1, 1]} : vector<1x128xf32> to vector<1x32xf32>
    %192 = vector.extract_strided_slice %190 {offsets = [0, 0], sizes = [1, 32], strides = [1, 1]} : vector<1x128xf32> to vector<1x32xf32>
    %193 = arith.addf %191, %192 : vector<1x32xf32>
    %194 = arith.negf %193 : vector<1x32xf32>
    %195 = math.exp %194 : vector<1x32xf32>
    %cst_59 = arith.constant 1.000000e+00 : f32
    %196 = vector.broadcast %cst_59 : f32 to vector<1x32xf32>
    %197 = arith.addf %196, %195 : vector<1x32xf32>
    %198 = arith.divf %196, %197 : vector<1x32xf32>
    %199 = vector.extract_strided_slice %187 {offsets = [0, 32], sizes = [1, 32], strides = [1, 1]} : vector<1x128xf32> to vector<1x32xf32>
    %200 = vector.extract_strided_slice %190 {offsets = [0, 32], sizes = [1, 32], strides = [1, 1]} : vector<1x128xf32> to vector<1x32xf32>
    %201 = arith.addf %199, %200 : vector<1x32xf32>
    %202 = arith.negf %201 : vector<1x32xf32>
    %203 = math.exp %202 : vector<1x32xf32>
    %cst_60 = arith.constant 1.000000e+00 : f32
    %204 = vector.broadcast %cst_60 : f32 to vector<1x32xf32>
    %205 = arith.addf %204, %203 : vector<1x32xf32>
    %206 = arith.divf %204, %205 : vector<1x32xf32>
    %207 = vector.extract_strided_slice %187 {offsets = [0, 64], sizes = [1, 32], strides = [1, 1]} : vector<1x128xf32> to vector<1x32xf32>
    %208 = vector.extract_strided_slice %190 {offsets = [0, 64], sizes = [1, 32], strides = [1, 1]} : vector<1x128xf32> to vector<1x32xf32>
    %209 = arith.mulf %198, %208 : vector<1x32xf32>
    %210 = arith.addf %207, %209 : vector<1x32xf32>
    %211 = math.tanh %210 : vector<1x32xf32>
    %cst_61 = arith.constant 1.000000e+00 : f32
    %212 = vector.broadcast %cst_61 : f32 to vector<1x32xf32>
    %213 = arith.subf %212, %206 : vector<1x32xf32>
    %214 = arith.mulf %213, %211 : vector<1x32xf32>
    %215 = arith.mulf %206, %183 : vector<1x32xf32>
    %216 = arith.addf %214, %215 : vector<1x32xf32>
    %217 = arith.index_cast %c5_i32 : i32 to index
    %c0_62 = arith.constant 0 : index
    %218 = vector.load %arg20[%217, %c0_62] : memref<8x32xf32, #tpu.memory_space<vmem>>, vector<1x32xf32>
    tpu.vector_store %arg20[%217, %c0_62], %216 {strides = array<i32>} : memref<8x32xf32, #tpu.memory_space<vmem>>, vector<1x32xf32>,
    %c6_i32 = arith.constant 6 : i32
    %219 = arith.index_cast %c6_i32 : i32 to index
    %c0_63 = arith.constant 0 : index
    %220 = vector.load %arg18[%219, %c0_63] : memref<8x128xf32, #tpu.memory_space<vmem>>, vector<1x128xf32>
    %221 = arith.truncf %216 : vector<1x32xf32> to vector<1x32xbf16>
    %cst_64 = arith.constant dense<0.000000e+00> : vector<1x128xf32>
    %222 = tpu.matmul %221, %16, %cst_64 {dimension_numbers = #tpu.dot_dimension_numbers<[1], [0], [0], [1], [0, 0, 1, 1], [], []>} : vector<1x32xbf16>, vector<32x128xbf16>, vector<1x128xf32> -> vector<1x128xf32>
    %223 = arith.addf %222, %17 : vector<1x128xf32>
    %224 = vector.extract_strided_slice %220 {offsets = [0, 0], sizes = [1, 32], strides = [1, 1]} : vector<1x128xf32> to vector<1x32xf32>
    %225 = vector.extract_strided_slice %223 {offsets = [0, 0], sizes = [1, 32], strides = [1, 1]} : vector<1x128xf32> to vector<1x32xf32>
    %226 = arith.addf %224, %225 : vector<1x32xf32>
    %227 = arith.negf %226 : vector<1x32xf32>
    %228 = math.exp %227 : vector<1x32xf32>
    %cst_65 = arith.constant 1.000000e+00 : f32
    %229 = vector.broadcast %cst_65 : f32 to vector<1x32xf32>
    %230 = arith.addf %229, %228 : vector<1x32xf32>
    %231 = arith.divf %229, %230 : vector<1x32xf32>
    %232 = vector.extract_strided_slice %220 {offsets = [0, 32], sizes = [1, 32], strides = [1, 1]} : vector<1x128xf32> to vector<1x32xf32>
    %233 = vector.extract_strided_slice %223 {offsets = [0, 32], sizes = [1, 32], strides = [1, 1]} : vector<1x128xf32> to vector<1x32xf32>
    %234 = arith.addf %232, %233 : vector<1x32xf32>
    %235 = arith.negf %234 : vector<1x32xf32>
    %236 = math.exp %235 : vector<1x32xf32>
    %cst_66 = arith.constant 1.000000e+00 : f32
    %237 = vector.broadcast %cst_66 : f32 to vector<1x32xf32>
    %238 = arith.addf %237, %236 : vector<1x32xf32>
    %239 = arith.divf %237, %238 : vector<1x32xf32>
    %240 = vector.extract_strided_slice %220 {offsets = [0, 64], sizes = [1, 32], strides = [1, 1]} : vector<1x128xf32> to vector<1x32xf32>
    %241 = vector.extract_strided_slice %223 {offsets = [0, 64], sizes = [1, 32], strides = [1, 1]} : vector<1x128xf32> to vector<1x32xf32>
    %242 = arith.mulf %231, %241 : vector<1x32xf32>
    %243 = arith.addf %240, %242 : vector<1x32xf32>
    %244 = math.tanh %243 : vector<1x32xf32>
    %cst_67 = arith.constant 1.000000e+00 : f32
    %245 = vector.broadcast %cst_67 : f32 to vector<1x32xf32>
    %246 = arith.subf %245, %239 : vector<1x32xf32>
    %247 = arith.mulf %246, %244 : vector<1x32xf32>
    %248 = arith.mulf %239, %216 : vector<1x32xf32>
    %249 = arith.addf %247, %248 : vector<1x32xf32>
    %250 = arith.index_cast %c6_i32 : i32 to index
    %c0_68 = arith.constant 0 : index
    %251 = vector.load %arg20[%250, %c0_68] : memref<8x32xf32, #tpu.memory_space<vmem>>, vector<1x32xf32>
    tpu.vector_store %arg20[%250, %c0_68], %249 {strides = array<i32>} : memref<8x32xf32, #tpu.memory_space<vmem>>, vector<1x32xf32>,
    %c7_i32 = arith.constant 7 : i32
    %252 = arith.index_cast %c7_i32 : i32 to index
    %c0_69 = arith.constant 0 : index
    %253 = vector.load %arg18[%252, %c0_69] : memref<8x128xf32, #tpu.memory_space<vmem>>, vector<1x128xf32>
    %254 = arith.truncf %249 : vector<1x32xf32> to vector<1x32xbf16>
    %cst_70 = arith.constant dense<0.000000e+00> : vector<1x128xf32>
    %255 = tpu.matmul %254, %16, %cst_70 {dimension_numbers = #tpu.dot_dimension_numbers<[1], [0], [0], [1], [0, 0, 1, 1], [], []>} : vector<1x32xbf16>, vector<32x128xbf16>, vector<1x128xf32> -> vector<1x128xf32>
    %256 = arith.addf %255, %17 : vector<1x128xf32>
    %257 = vector.extract_strided_slice %253 {offsets = [0, 0], sizes = [1, 32], strides = [1, 1]} : vector<1x128xf32> to vector<1x32xf32>
    %258 = vector.extract_strided_slice %256 {offsets = [0, 0], sizes = [1, 32], strides = [1, 1]} : vector<1x128xf32> to vector<1x32xf32>
    %259 = arith.addf %257, %258 : vector<1x32xf32>
    %260 = arith.negf %259 : vector<1x32xf32>
    %261 = math.exp %260 : vector<1x32xf32>
    %cst_71 = arith.constant 1.000000e+00 : f32
    %262 = vector.broadcast %cst_71 : f32 to vector<1x32xf32>
    %263 = arith.addf %262, %261 : vector<1x32xf32>
    %264 = arith.divf %262, %263 : vector<1x32xf32>
    %265 = vector.extract_strided_slice %253 {offsets = [0, 32], sizes = [1, 32], strides = [1, 1]} : vector<1x128xf32> to vector<1x32xf32>
    %266 = vector.extract_strided_slice %256 {offsets = [0, 32], sizes = [1, 32], strides = [1, 1]} : vector<1x128xf32> to vector<1x32xf32>
    %267 = arith.addf %265, %266 : vector<1x32xf32>
    %268 = arith.negf %267 : vector<1x32xf32>
    %269 = math.exp %268 : vector<1x32xf32>
    %cst_72 = arith.constant 1.000000e+00 : f32
    %270 = vector.broadcast %cst_72 : f32 to vector<1x32xf32>
    %271 = arith.addf %270, %269 : vector<1x32xf32>
    %272 = arith.divf %270, %271 : vector<1x32xf32>
    %273 = vector.extract_strided_slice %253 {offsets = [0, 64], sizes = [1, 32], strides = [1, 1]} : vector<1x128xf32> to vector<1x32xf32>
    %274 = vector.extract_strided_slice %256 {offsets = [0, 64], sizes = [1, 32], strides = [1, 1]} : vector<1x128xf32> to vector<1x32xf32>
    %275 = arith.mulf %264, %274 : vector<1x32xf32>
    %276 = arith.addf %273, %275 : vector<1x32xf32>
    %277 = math.tanh %276 : vector<1x32xf32>
    %cst_73 = arith.constant 1.000000e+00 : f32
    %278 = vector.broadcast %cst_73 : f32 to vector<1x32xf32>
    %279 = arith.subf %278, %272 : vector<1x32xf32>
    %280 = arith.mulf %279, %277 : vector<1x32xf32>
    %281 = arith.mulf %272, %249 : vector<1x32xf32>
    %282 = arith.addf %280, %281 : vector<1x32xf32>
    %283 = arith.index_cast %c7_i32 : i32 to index
    %c0_74 = arith.constant 0 : index
    %284 = vector.load %arg20[%283, %c0_74] : memref<8x32xf32, #tpu.memory_space<vmem>>, vector<1x32xf32>
    tpu.vector_store %arg20[%283, %c0_74], %282 {strides = array<i32>} : memref<8x32xf32, #tpu.memory_space<vmem>>, vector<1x32xf32>,
    %c8_i32 = arith.constant 8 : i32
    %c0_i32_75 = arith.constant 0 : i32
    %285 = arith.index_cast %c0_i32_75 : i32 to index
    %c0_76 = arith.constant 0 : index
    %286 = vector.load %arg19[%285, %c0_76] : memref<8x128xf32, #tpu.memory_space<vmem>>, vector<1x128xf32>
    %287 = arith.truncf %282 : vector<1x32xf32> to vector<1x32xbf16>
    %cst_77 = arith.constant dense<0.000000e+00> : vector<1x128xf32>
    %288 = tpu.matmul %287, %18, %cst_77 {dimension_numbers = #tpu.dot_dimension_numbers<[1], [0], [0], [1], [0, 0, 1, 1], [], []>} : vector<1x32xbf16>, vector<32x128xbf16>, vector<1x128xf32> -> vector<1x128xf32>
    %289 = arith.addf %288, %19 : vector<1x128xf32>
    %290 = vector.extract_strided_slice %286 {offsets = [0, 0], sizes = [1, 32], strides = [1, 1]} : vector<1x128xf32> to vector<1x32xf32>
    %291 = vector.extract_strided_slice %289 {offsets = [0, 0], sizes = [1, 32], strides = [1, 1]} : vector<1x128xf32> to vector<1x32xf32>
    %292 = arith.addf %290, %291 : vector<1x32xf32>
    %293 = arith.negf %292 : vector<1x32xf32>
    %294 = math.exp %293 : vector<1x32xf32>
    %cst_78 = arith.constant 1.000000e+00 : f32
    %295 = vector.broadcast %cst_78 : f32 to vector<1x32xf32>
    %296 = arith.addf %295, %294 : vector<1x32xf32>
    %297 = arith.divf %295, %296 : vector<1x32xf32>
    %298 = vector.extract_strided_slice %286 {offsets = [0, 32], sizes = [1, 32], strides = [1, 1]} : vector<1x128xf32> to vector<1x32xf32>
    %299 = vector.extract_strided_slice %289 {offsets = [0, 32], sizes = [1, 32], strides = [1, 1]} : vector<1x128xf32> to vector<1x32xf32>
    %300 = arith.addf %298, %299 : vector<1x32xf32>
    %301 = arith.negf %300 : vector<1x32xf32>
    %302 = math.exp %301 : vector<1x32xf32>
    %cst_79 = arith.constant 1.000000e+00 : f32
    %303 = vector.broadcast %cst_79 : f32 to vector<1x32xf32>
    %304 = arith.addf %303, %302 : vector<1x32xf32>
    %305 = arith.divf %303, %304 : vector<1x32xf32>
    %306 = vector.extract_strided_slice %286 {offsets = [0, 64], sizes = [1, 32], strides = [1, 1]} : vector<1x128xf32> to vector<1x32xf32>
    %307 = vector.extract_strided_slice %289 {offsets = [0, 64], sizes = [1, 32], strides = [1, 1]} : vector<1x128xf32> to vector<1x32xf32>
    %308 = arith.mulf %297, %307 : vector<1x32xf32>
    %309 = arith.addf %306, %308 : vector<1x32xf32>
    %310 = math.tanh %309 : vector<1x32xf32>
    %cst_80 = arith.constant 1.000000e+00 : f32
    %311 = vector.broadcast %cst_80 : f32 to vector<1x32xf32>
    %312 = arith.subf %311, %305 : vector<1x32xf32>
    %313 = arith.mulf %312, %310 : vector<1x32xf32>
    %314 = arith.mulf %305, %282 : vector<1x32xf32>
    %315 = arith.addf %313, %314 : vector<1x32xf32>
    %316 = arith.index_cast %c0_i32_75 : i32 to index
    %c0_81 = arith.constant 0 : index
    %317 = vector.load %arg21[%316, %c0_81] : memref<8x32xf32, #tpu.memory_space<vmem>>, vector<1x32xf32>
    tpu.vector_store %arg21[%316, %c0_81], %315 {strides = array<i32>} : memref<8x32xf32, #tpu.memory_space<vmem>>, vector<1x32xf32>,
    %c1_i32_82 = arith.constant 1 : i32
    %318 = arith.index_cast %c1_i32_82 : i32 to index
    %c0_83 = arith.constant 0 : index
    %319 = vector.load %arg19[%318, %c0_83] : memref<8x128xf32, #tpu.memory_space<vmem>>, vector<1x128xf32>
    %320 = arith.truncf %315 : vector<1x32xf32> to vector<1x32xbf16>
    %cst_84 = arith.constant dense<0.000000e+00> : vector<1x128xf32>
    %321 = tpu.matmul %320, %18, %cst_84 {dimension_numbers = #tpu.dot_dimension_numbers<[1], [0], [0], [1], [0, 0, 1, 1], [], []>} : vector<1x32xbf16>, vector<32x128xbf16>, vector<1x128xf32> -> vector<1x128xf32>
    %322 = arith.addf %321, %19 : vector<1x128xf32>
    %323 = vector.extract_strided_slice %319 {offsets = [0, 0], sizes = [1, 32], strides = [1, 1]} : vector<1x128xf32> to vector<1x32xf32>
    %324 = vector.extract_strided_slice %322 {offsets = [0, 0], sizes = [1, 32], strides = [1, 1]} : vector<1x128xf32> to vector<1x32xf32>
    %325 = arith.addf %323, %324 : vector<1x32xf32>
    %326 = arith.negf %325 : vector<1x32xf32>
    %327 = math.exp %326 : vector<1x32xf32>
    %cst_85 = arith.constant 1.000000e+00 : f32
    %328 = vector.broadcast %cst_85 : f32 to vector<1x32xf32>
    %329 = arith.addf %328, %327 : vector<1x32xf32>
    %330 = arith.divf %328, %329 : vector<1x32xf32>
    %331 = vector.extract_strided_slice %319 {offsets = [0, 32], sizes = [1, 32], strides = [1, 1]} : vector<1x128xf32> to vector<1x32xf32>
    %332 = vector.extract_strided_slice %322 {offsets = [0, 32], sizes = [1, 32], strides = [1, 1]} : vector<1x128xf32> to vector<1x32xf32>
    %333 = arith.addf %331, %332 : vector<1x32xf32>
    %334 = arith.negf %333 : vector<1x32xf32>
    %335 = math.exp %334 : vector<1x32xf32>
    %cst_86 = arith.constant 1.000000e+00 : f32
    %336 = vector.broadcast %cst_86 : f32 to vector<1x32xf32>
    %337 = arith.addf %336, %335 : vector<1x32xf32>
    %338 = arith.divf %336, %337 : vector<1x32xf32>
    %339 = vector.extract_strided_slice %319 {offsets = [0, 64], sizes = [1, 32], strides = [1, 1]} : vector<1x128xf32> to vector<1x32xf32>
    %340 = vector.extract_strided_slice %322 {offsets = [0, 64], sizes = [1, 32], strides = [1, 1]} : vector<1x128xf32> to vector<1x32xf32>
    %341 = arith.mulf %330, %340 : vector<1x32xf32>
    %342 = arith.addf %339, %341 : vector<1x32xf32>
    %343 = math.tanh %342 : vector<1x32xf32>
    %cst_87 = arith.constant 1.000000e+00 : f32
    %344 = vector.broadcast %cst_87 : f32 to vector<1x32xf32>
    %345 = arith.subf %344, %338 : vector<1x32xf32>
    %346 = arith.mulf %345, %343 : vector<1x32xf32>
    %347 = arith.mulf %338, %315 : vector<1x32xf32>
    %348 = arith.addf %346, %347 : vector<1x32xf32>
    %349 = arith.index_cast %c1_i32_82 : i32 to index
    %c0_88 = arith.constant 0 : index
    %350 = vector.load %arg21[%349, %c0_88] : memref<8x32xf32, #tpu.memory_space<vmem>>, vector<1x32xf32>
    tpu.vector_store %arg21[%349, %c0_88], %348 {strides = array<i32>} : memref<8x32xf32, #tpu.memory_space<vmem>>, vector<1x32xf32>,
    %c2_i32_89 = arith.constant 2 : i32
    %351 = arith.index_cast %c2_i32_89 : i32 to index
    %c0_90 = arith.constant 0 : index
    %352 = vector.load %arg19[%351, %c0_90] : memref<8x128xf32, #tpu.memory_space<vmem>>, vector<1x128xf32>
    %353 = arith.truncf %348 : vector<1x32xf32> to vector<1x32xbf16>
    %cst_91 = arith.constant dense<0.000000e+00> : vector<1x128xf32>
    %354 = tpu.matmul %353, %18, %cst_91 {dimension_numbers = #tpu.dot_dimension_numbers<[1], [0], [0], [1], [0, 0, 1, 1], [], []>} : vector<1x32xbf16>, vector<32x128xbf16>, vector<1x128xf32> -> vector<1x128xf32>
    %355 = arith.addf %354, %19 : vector<1x128xf32>
    %356 = vector.extract_strided_slice %352 {offsets = [0, 0], sizes = [1, 32], strides = [1, 1]} : vector<1x128xf32> to vector<1x32xf32>
    %357 = vector.extract_strided_slice %355 {offsets = [0, 0], sizes = [1, 32], strides = [1, 1]} : vector<1x128xf32> to vector<1x32xf32>
    %358 = arith.addf %356, %357 : vector<1x32xf32>
    %359 = arith.negf %358 : vector<1x32xf32>
    %360 = math.exp %359 : vector<1x32xf32>
    %cst_92 = arith.constant 1.000000e+00 : f32
    %361 = vector.broadcast %cst_92 : f32 to vector<1x32xf32>
    %362 = arith.addf %361, %360 : vector<1x32xf32>
    %363 = arith.divf %361, %362 : vector<1x32xf32>
    %364 = vector.extract_strided_slice %352 {offsets = [0, 32], sizes = [1, 32], strides = [1, 1]} : vector<1x128xf32> to vector<1x32xf32>
    %365 = vector.extract_strided_slice %355 {offsets = [0, 32], sizes = [1, 32], strides = [1, 1]} : vector<1x128xf32> to vector<1x32xf32>
    %366 = arith.addf %364, %365 : vector<1x32xf32>
    %367 = arith.negf %366 : vector<1x32xf32>
    %368 = math.exp %367 : vector<1x32xf32>
    %cst_93 = arith.constant 1.000000e+00 : f32
    %369 = vector.broadcast %cst_93 : f32 to vector<1x32xf32>
    %370 = arith.addf %369, %368 : vector<1x32xf32>
    %371 = arith.divf %369, %370 : vector<1x32xf32>
    %372 = vector.extract_strided_slice %352 {offsets = [0, 64], sizes = [1, 32], strides = [1, 1]} : vector<1x128xf32> to vector<1x32xf32>
    %373 = vector.extract_strided_slice %355 {offsets = [0, 64], sizes = [1, 32], strides = [1, 1]} : vector<1x128xf32> to vector<1x32xf32>
    %374 = arith.mulf %363, %373 : vector<1x32xf32>
    %375 = arith.addf %372, %374 : vector<1x32xf32>
    %376 = math.tanh %375 : vector<1x32xf32>
    %cst_94 = arith.constant 1.000000e+00 : f32
    %377 = vector.broadcast %cst_94 : f32 to vector<1x32xf32>
    %378 = arith.subf %377, %371 : vector<1x32xf32>
    %379 = arith.mulf %378, %376 : vector<1x32xf32>
    %380 = arith.mulf %371, %348 : vector<1x32xf32>
    %381 = arith.addf %379, %380 : vector<1x32xf32>
    %382 = arith.index_cast %c2_i32_89 : i32 to index
    %c0_95 = arith.constant 0 : index
    %383 = vector.load %arg21[%382, %c0_95] : memref<8x32xf32, #tpu.memory_space<vmem>>, vector<1x32xf32>
    tpu.vector_store %arg21[%382, %c0_95], %381 {strides = array<i32>} : memref<8x32xf32, #tpu.memory_space<vmem>>, vector<1x32xf32>,
    %c3_i32_96 = arith.constant 3 : i32
    %384 = arith.index_cast %c3_i32_96 : i32 to index
    %c0_97 = arith.constant 0 : index
    %385 = vector.load %arg19[%384, %c0_97] : memref<8x128xf32, #tpu.memory_space<vmem>>, vector<1x128xf32>
    %386 = arith.truncf %381 : vector<1x32xf32> to vector<1x32xbf16>
    %cst_98 = arith.constant dense<0.000000e+00> : vector<1x128xf32>
    %387 = tpu.matmul %386, %18, %cst_98 {dimension_numbers = #tpu.dot_dimension_numbers<[1], [0], [0], [1], [0, 0, 1, 1], [], []>} : vector<1x32xbf16>, vector<32x128xbf16>, vector<1x128xf32> -> vector<1x128xf32>
    %388 = arith.addf %387, %19 : vector<1x128xf32>
    %389 = vector.extract_strided_slice %385 {offsets = [0, 0], sizes = [1, 32], strides = [1, 1]} : vector<1x128xf32> to vector<1x32xf32>
    %390 = vector.extract_strided_slice %388 {offsets = [0, 0], sizes = [1, 32], strides = [1, 1]} : vector<1x128xf32> to vector<1x32xf32>
    %391 = arith.addf %389, %390 : vector<1x32xf32>
    %392 = arith.negf %391 : vector<1x32xf32>
    %393 = math.exp %392 : vector<1x32xf32>
    %cst_99 = arith.constant 1.000000e+00 : f32
    %394 = vector.broadcast %cst_99 : f32 to vector<1x32xf32>
    %395 = arith.addf %394, %393 : vector<1x32xf32>
    %396 = arith.divf %394, %395 : vector<1x32xf32>
    %397 = vector.extract_strided_slice %385 {offsets = [0, 32], sizes = [1, 32], strides = [1, 1]} : vector<1x128xf32> to vector<1x32xf32>
    %398 = vector.extract_strided_slice %388 {offsets = [0, 32], sizes = [1, 32], strides = [1, 1]} : vector<1x128xf32> to vector<1x32xf32>
    %399 = arith.addf %397, %398 : vector<1x32xf32>
    %400 = arith.negf %399 : vector<1x32xf32>
    %401 = math.exp %400 : vector<1x32xf32>
    %cst_100 = arith.constant 1.000000e+00 : f32
    %402 = vector.broadcast %cst_100 : f32 to vector<1x32xf32>
    %403 = arith.addf %402, %401 : vector<1x32xf32>
    %404 = arith.divf %402, %403 : vector<1x32xf32>
    %405 = vector.extract_strided_slice %385 {offsets = [0, 64], sizes = [1, 32], strides = [1, 1]} : vector<1x128xf32> to vector<1x32xf32>
    %406 = vector.extract_strided_slice %388 {offsets = [0, 64], sizes = [1, 32], strides = [1, 1]} : vector<1x128xf32> to vector<1x32xf32>
    %407 = arith.mulf %396, %406 : vector<1x32xf32>
    %408 = arith.addf %405, %407 : vector<1x32xf32>
    %409 = math.tanh %408 : vector<1x32xf32>
    %cst_101 = arith.constant 1.000000e+00 : f32
    %410 = vector.broadcast %cst_101 : f32 to vector<1x32xf32>
    %411 = arith.subf %410, %404 : vector<1x32xf32>
    %412 = arith.mulf %411, %409 : vector<1x32xf32>
    %413 = arith.mulf %404, %381 : vector<1x32xf32>
    %414 = arith.addf %412, %413 : vector<1x32xf32>
    %415 = arith.index_cast %c3_i32_96 : i32 to index
    %c0_102 = arith.constant 0 : index
    %416 = vector.load %arg21[%415, %c0_102] : memref<8x32xf32, #tpu.memory_space<vmem>>, vector<1x32xf32>
    tpu.vector_store %arg21[%415, %c0_102], %414 {strides = array<i32>} : memref<8x32xf32, #tpu.memory_space<vmem>>, vector<1x32xf32>,
    %c4_i32_103 = arith.constant 4 : i32
    %417 = arith.index_cast %c4_i32_103 : i32 to index
    %c0_104 = arith.constant 0 : index
    %418 = vector.load %arg19[%417, %c0_104] : memref<8x128xf32, #tpu.memory_space<vmem>>, vector<1x128xf32>
    %419 = arith.truncf %414 : vector<1x32xf32> to vector<1x32xbf16>
    %cst_105 = arith.constant dense<0.000000e+00> : vector<1x128xf32>
    %420 = tpu.matmul %419, %18, %cst_105 {dimension_numbers = #tpu.dot_dimension_numbers<[1], [0], [0], [1], [0, 0, 1, 1], [], []>} : vector<1x32xbf16>, vector<32x128xbf16>, vector<1x128xf32> -> vector<1x128xf32>
    %421 = arith.addf %420, %19 : vector<1x128xf32>
    %422 = vector.extract_strided_slice %418 {offsets = [0, 0], sizes = [1, 32], strides = [1, 1]} : vector<1x128xf32> to vector<1x32xf32>
    %423 = vector.extract_strided_slice %421 {offsets = [0, 0], sizes = [1, 32], strides = [1, 1]} : vector<1x128xf32> to vector<1x32xf32>
    %424 = arith.addf %422, %423 : vector<1x32xf32>
    %425 = arith.negf %424 : vector<1x32xf32>
    %426 = math.exp %425 : vector<1x32xf32>
    %cst_106 = arith.constant 1.000000e+00 : f32
    %427 = vector.broadcast %cst_106 : f32 to vector<1x32xf32>
    %428 = arith.addf %427, %426 : vector<1x32xf32>
    %429 = arith.divf %427, %428 : vector<1x32xf32>
    %430 = vector.extract_strided_slice %418 {offsets = [0, 32], sizes = [1, 32], strides = [1, 1]} : vector<1x128xf32> to vector<1x32xf32>
    %431 = vector.extract_strided_slice %421 {offsets = [0, 32], sizes = [1, 32], strides = [1, 1]} : vector<1x128xf32> to vector<1x32xf32>
    %432 = arith.addf %430, %431 : vector<1x32xf32>
    %433 = arith.negf %432 : vector<1x32xf32>
    %434 = math.exp %433 : vector<1x32xf32>
    %cst_107 = arith.constant 1.000000e+00 : f32
    %435 = vector.broadcast %cst_107 : f32 to vector<1x32xf32>
    %436 = arith.addf %435, %434 : vector<1x32xf32>
    %437 = arith.divf %435, %436 : vector<1x32xf32>
    %438 = vector.extract_strided_slice %418 {offsets = [0, 64], sizes = [1, 32], strides = [1, 1]} : vector<1x128xf32> to vector<1x32xf32>
    %439 = vector.extract_strided_slice %421 {offsets = [0, 64], sizes = [1, 32], strides = [1, 1]} : vector<1x128xf32> to vector<1x32xf32>
    %440 = arith.mulf %429, %439 : vector<1x32xf32>
    %441 = arith.addf %438, %440 : vector<1x32xf32>
    %442 = math.tanh %441 : vector<1x32xf32>
    %cst_108 = arith.constant 1.000000e+00 : f32
    %443 = vector.broadcast %cst_108 : f32 to vector<1x32xf32>
    %444 = arith.subf %443, %437 : vector<1x32xf32>
    %445 = arith.mulf %444, %442 : vector<1x32xf32>
    %446 = arith.mulf %437, %414 : vector<1x32xf32>
    %447 = arith.addf %445, %446 : vector<1x32xf32>
    %448 = arith.index_cast %c4_i32_103 : i32 to index
    %c0_109 = arith.constant 0 : index
    %449 = vector.load %arg21[%448, %c0_109] : memref<8x32xf32, #tpu.memory_space<vmem>>, vector<1x32xf32>
    tpu.vector_store %arg21[%448, %c0_109], %447 {strides = array<i32>} : memref<8x32xf32, #tpu.memory_space<vmem>>, vector<1x32xf32>,
    %c5_i32_110 = arith.constant 5 : i32
    %450 = arith.index_cast %c5_i32_110 : i32 to index
    %c0_111 = arith.constant 0 : index
    %451 = vector.load %arg19[%450, %c0_111] : memref<8x128xf32, #tpu.memory_space<vmem>>, vector<1x128xf32>
    %452 = arith.truncf %447 : vector<1x32xf32> to vector<1x32xbf16>
    %cst_112 = arith.constant dense<0.000000e+00> : vector<1x128xf32>
    %453 = tpu.matmul %452, %18, %cst_112 {dimension_numbers = #tpu.dot_dimension_numbers<[1], [0], [0], [1], [0, 0, 1, 1], [], []>} : vector<1x32xbf16>, vector<32x128xbf16>, vector<1x128xf32> -> vector<1x128xf32>
    %454 = arith.addf %453, %19 : vector<1x128xf32>
    %455 = vector.extract_strided_slice %451 {offsets = [0, 0], sizes = [1, 32], strides = [1, 1]} : vector<1x128xf32> to vector<1x32xf32>
    %456 = vector.extract_strided_slice %454 {offsets = [0, 0], sizes = [1, 32], strides = [1, 1]} : vector<1x128xf32> to vector<1x32xf32>
    %457 = arith.addf %455, %456 : vector<1x32xf32>
    %458 = arith.negf %457 : vector<1x32xf32>
    %459 = math.exp %458 : vector<1x32xf32>
    %cst_113 = arith.constant 1.000000e+00 : f32
    %460 = vector.broadcast %cst_113 : f32 to vector<1x32xf32>
    %461 = arith.addf %460, %459 : vector<1x32xf32>
    %462 = arith.divf %460, %461 : vector<1x32xf32>
    %463 = vector.extract_strided_slice %451 {offsets = [0, 32], sizes = [1, 32], strides = [1, 1]} : vector<1x128xf32> to vector<1x32xf32>
    %464 = vector.extract_strided_slice %454 {offsets = [0, 32], sizes = [1, 32], strides = [1, 1]} : vector<1x128xf32> to vector<1x32xf32>
    %465 = arith.addf %463, %464 : vector<1x32xf32>
    %466 = arith.negf %465 : vector<1x32xf32>
    %467 = math.exp %466 : vector<1x32xf32>
    %cst_114 = arith.constant 1.000000e+00 : f32
    %468 = vector.broadcast %cst_114 : f32 to vector<1x32xf32>
    %469 = arith.addf %468, %467 : vector<1x32xf32>
    %470 = arith.divf %468, %469 : vector<1x32xf32>
    %471 = vector.extract_strided_slice %451 {offsets = [0, 64], sizes = [1, 32], strides = [1, 1]} : vector<1x128xf32> to vector<1x32xf32>
    %472 = vector.extract_strided_slice %454 {offsets = [0, 64], sizes = [1, 32], strides = [1, 1]} : vector<1x128xf32> to vector<1x32xf32>
    %473 = arith.mulf %462, %472 : vector<1x32xf32>
    %474 = arith.addf %471, %473 : vector<1x32xf32>
    %475 = math.tanh %474 : vector<1x32xf32>
    %cst_115 = arith.constant 1.000000e+00 : f32
    %476 = vector.broadcast %cst_115 : f32 to vector<1x32xf32>
    %477 = arith.subf %476, %470 : vector<1x32xf32>
    %478 = arith.mulf %477, %475 : vector<1x32xf32>
    %479 = arith.mulf %470, %447 : vector<1x32xf32>
    %480 = arith.addf %478, %479 : vector<1x32xf32>
    %481 = arith.index_cast %c5_i32_110 : i32 to index
    %c0_116 = arith.constant 0 : index
    %482 = vector.load %arg21[%481, %c0_116] : memref<8x32xf32, #tpu.memory_space<vmem>>, vector<1x32xf32>
    tpu.vector_store %arg21[%481, %c0_116], %480 {strides = array<i32>} : memref<8x32xf32, #tpu.memory_space<vmem>>, vector<1x32xf32>,
    %c6_i32_117 = arith.constant 6 : i32
    %483 = arith.index_cast %c6_i32_117 : i32 to index
    %c0_118 = arith.constant 0 : index
    %484 = vector.load %arg19[%483, %c0_118] : memref<8x128xf32, #tpu.memory_space<vmem>>, vector<1x128xf32>
    %485 = arith.truncf %480 : vector<1x32xf32> to vector<1x32xbf16>
    %cst_119 = arith.constant dense<0.000000e+00> : vector<1x128xf32>
    %486 = tpu.matmul %485, %18, %cst_119 {dimension_numbers = #tpu.dot_dimension_numbers<[1], [0], [0], [1], [0, 0, 1, 1], [], []>} : vector<1x32xbf16>, vector<32x128xbf16>, vector<1x128xf32> -> vector<1x128xf32>
    %487 = arith.addf %486, %19 : vector<1x128xf32>
    %488 = vector.extract_strided_slice %484 {offsets = [0, 0], sizes = [1, 32], strides = [1, 1]} : vector<1x128xf32> to vector<1x32xf32>
    %489 = vector.extract_strided_slice %487 {offsets = [0, 0], sizes = [1, 32], strides = [1, 1]} : vector<1x128xf32> to vector<1x32xf32>
    %490 = arith.addf %488, %489 : vector<1x32xf32>
    %491 = arith.negf %490 : vector<1x32xf32>
    %492 = math.exp %491 : vector<1x32xf32>
    %cst_120 = arith.constant 1.000000e+00 : f32
    %493 = vector.broadcast %cst_120 : f32 to vector<1x32xf32>
    %494 = arith.addf %493, %492 : vector<1x32xf32>
    %495 = arith.divf %493, %494 : vector<1x32xf32>
    %496 = vector.extract_strided_slice %484 {offsets = [0, 32], sizes = [1, 32], strides = [1, 1]} : vector<1x128xf32> to vector<1x32xf32>
    %497 = vector.extract_strided_slice %487 {offsets = [0, 32], sizes = [1, 32], strides = [1, 1]} : vector<1x128xf32> to vector<1x32xf32>
    %498 = arith.addf %496, %497 : vector<1x32xf32>
    %499 = arith.negf %498 : vector<1x32xf32>
    %500 = math.exp %499 : vector<1x32xf32>
    %cst_121 = arith.constant 1.000000e+00 : f32
    %501 = vector.broadcast %cst_121 : f32 to vector<1x32xf32>
    %502 = arith.addf %501, %500 : vector<1x32xf32>
    %503 = arith.divf %501, %502 : vector<1x32xf32>
    %504 = vector.extract_strided_slice %484 {offsets = [0, 64], sizes = [1, 32], strides = [1, 1]} : vector<1x128xf32> to vector<1x32xf32>
    %505 = vector.extract_strided_slice %487 {offsets = [0, 64], sizes = [1, 32], strides = [1, 1]} : vector<1x128xf32> to vector<1x32xf32>
    %506 = arith.mulf %495, %505 : vector<1x32xf32>
    %507 = arith.addf %504, %506 : vector<1x32xf32>
    %508 = math.tanh %507 : vector<1x32xf32>
    %cst_122 = arith.constant 1.000000e+00 : f32
    %509 = vector.broadcast %cst_122 : f32 to vector<1x32xf32>
    %510 = arith.subf %509, %503 : vector<1x32xf32>
    %511 = arith.mulf %510, %508 : vector<1x32xf32>
    %512 = arith.mulf %503, %480 : vector<1x32xf32>
    %513 = arith.addf %511, %512 : vector<1x32xf32>
    %514 = arith.index_cast %c6_i32_117 : i32 to index
    %c0_123 = arith.constant 0 : index
    %515 = vector.load %arg21[%514, %c0_123] : memref<8x32xf32, #tpu.memory_space<vmem>>, vector<1x32xf32>
    tpu.vector_store %arg21[%514, %c0_123], %513 {strides = array<i32>} : memref<8x32xf32, #tpu.memory_space<vmem>>, vector<1x32xf32>,
    %c7_i32_124 = arith.constant 7 : i32
    %516 = arith.index_cast %c7_i32_124 : i32 to index
    %c0_125 = arith.constant 0 : index
    %517 = vector.load %arg19[%516, %c0_125] : memref<8x128xf32, #tpu.memory_space<vmem>>, vector<1x128xf32>
    %518 = arith.truncf %513 : vector<1x32xf32> to vector<1x32xbf16>
    %cst_126 = arith.constant dense<0.000000e+00> : vector<1x128xf32>
    %519 = tpu.matmul %518, %18, %cst_126 {dimension_numbers = #tpu.dot_dimension_numbers<[1], [0], [0], [1], [0, 0, 1, 1], [], []>} : vector<1x32xbf16>, vector<32x128xbf16>, vector<1x128xf32> -> vector<1x128xf32>
    %520 = arith.addf %519, %19 : vector<1x128xf32>
    %521 = vector.extract_strided_slice %517 {offsets = [0, 0], sizes = [1, 32], strides = [1, 1]} : vector<1x128xf32> to vector<1x32xf32>
    %522 = vector.extract_strided_slice %520 {offsets = [0, 0], sizes = [1, 32], strides = [1, 1]} : vector<1x128xf32> to vector<1x32xf32>
    %523 = arith.addf %521, %522 : vector<1x32xf32>
    %524 = arith.negf %523 : vector<1x32xf32>
    %525 = math.exp %524 : vector<1x32xf32>
    %cst_127 = arith.constant 1.000000e+00 : f32
    %526 = vector.broadcast %cst_127 : f32 to vector<1x32xf32>
    %527 = arith.addf %526, %525 : vector<1x32xf32>
    %528 = arith.divf %526, %527 : vector<1x32xf32>
    %529 = vector.extract_strided_slice %517 {offsets = [0, 32], sizes = [1, 32], strides = [1, 1]} : vector<1x128xf32> to vector<1x32xf32>
    %530 = vector.extract_strided_slice %520 {offsets = [0, 32], sizes = [1, 32], strides = [1, 1]} : vector<1x128xf32> to vector<1x32xf32>
    %531 = arith.addf %529, %530 : vector<1x32xf32>
    %532 = arith.negf %531 : vector<1x32xf32>
    %533 = math.exp %532 : vector<1x32xf32>
    %cst_128 = arith.constant 1.000000e+00 : f32
    %534 = vector.broadcast %cst_128 : f32 to vector<1x32xf32>
    %535 = arith.addf %534, %533 : vector<1x32xf32>
    %536 = arith.divf %534, %535 : vector<1x32xf32>
    %537 = vector.extract_strided_slice %517 {offsets = [0, 64], sizes = [1, 32], strides = [1, 1]} : vector<1x128xf32> to vector<1x32xf32>
    %538 = vector.extract_strided_slice %520 {offsets = [0, 64], sizes = [1, 32], strides = [1, 1]} : vector<1x128xf32> to vector<1x32xf32>
    %539 = arith.mulf %528, %538 : vector<1x32xf32>
    %540 = arith.addf %537, %539 : vector<1x32xf32>
    %541 = math.tanh %540 : vector<1x32xf32>
    %cst_129 = arith.constant 1.000000e+00 : f32
    %542 = vector.broadcast %cst_129 : f32 to vector<1x32xf32>
    %543 = arith.subf %542, %536 : vector<1x32xf32>
    %544 = arith.mulf %543, %541 : vector<1x32xf32>
    %545 = arith.mulf %536, %513 : vector<1x32xf32>
    %546 = arith.addf %544, %545 : vector<1x32xf32>
    %547 = arith.index_cast %c7_i32_124 : i32 to index
    %c0_130 = arith.constant 0 : index
    %548 = vector.load %arg21[%547, %c0_130] : memref<8x32xf32, #tpu.memory_space<vmem>>, vector<1x32xf32>
    tpu.vector_store %arg21[%547, %c0_130], %546 {strides = array<i32>} : memref<8x32xf32, #tpu.memory_space<vmem>>, vector<1x32xf32>,
    %c8_i32_131 = arith.constant 8 : i32
    %c0_132 = arith.constant 0 : index
    %c0_133 = arith.constant 0 : index
    %549 = vector.load %arg20[%c0_132, %c0_133] : memref<8x32xf32, #tpu.memory_space<vmem>>, vector<8x32xf32>
    %550 = arith.truncf %549 : vector<8x32xf32> to vector<8x32xbf16>
    %c0_134 = arith.constant 0 : index
    %c0_135 = arith.constant 0 : index
    %551 = vector.load %arg21[%c0_134, %c0_135] : memref<8x32xf32, #tpu.memory_space<vmem>>, vector<8x32xf32>
    %552 = arith.truncf %551 : vector<8x32xf32> to vector<8x32xbf16>
    %cst_136 = arith.constant dense<0.000000e+00> : vector<8x8xf32>
    %553 = tpu.matmul %552, %550, %cst_136 {dimension_numbers = #tpu.dot_dimension_numbers<[1], [1], [0], [0], [0, 0, 1, 0], [], []>} : vector<8x32xbf16>, vector<8x32xbf16>, vector<8x8xf32> -> vector<8x8xf32>
    %c0_137 = arith.constant 0 : index
    %c0_138 = arith.constant 0 : index
    %c0_139 = arith.constant 0 : index
    %554 = vector.load %arg3[%c0_137, %c0_138, %c0_139] : memref<1x1x8xf32, #tpu.memory_space<vmem>>, vector<1x1x8xf32>
    %555 = vector.shape_cast %554 : vector<1x1x8xf32> to vector<1x8xf32>
    %556 = vector.broadcast %555 : vector<1x8xf32> to vector<8x8xf32>
    %557 = arith.addf %553, %556 : vector<8x8xf32>
    %cst_140 = arith.constant dense<0xFF800000> : vector<8xf32>
    %558 = vector.multi_reduction <maximumf>, %557, %cst_140 [1] : vector<8x8xf32> to vector<8xf32>
    %559 = vector.shape_cast %558 : vector<8xf32> to vector<8x1xf32>
    %560 = vector.broadcast %559 : vector<8x1xf32> to vector<8x8xf32>
    %561 = arith.subf %557, %560 : vector<8x8xf32>
    %562 = math.exp %561 : vector<8x8xf32>
    %cst_141 = arith.constant dense<0.000000e+00> : vector<8xf32>
    %563 = vector.multi_reduction <add>, %562, %cst_141 [1] : vector<8x8xf32> to vector<8xf32>
    %564 = vector.shape_cast %563 : vector<8xf32> to vector<8x1xf32>
    %565 = tpu.reciprocal %564 {approx = true} : vector<8x1xf32> -> vector<8x1xf32>
    %566 = vector.broadcast %565 : vector<8x1xf32> to vector<8x8xf32>
    %567 = arith.mulf %562, %566 : vector<8x8xf32>
    %568 = arith.truncf %567 : vector<8x8xf32> to vector<8x8xbf16>
    %cst_142 = arith.constant dense<0.000000e+00> : vector<8x32xf32>
    %569 = tpu.matmul %568, %550, %cst_142 {dimension_numbers = #tpu.dot_dimension_numbers<[1], [0], [0], [1], [0, 0, 1, 1], [], []>} : vector<8x8xbf16>, vector<8x32xbf16>, vector<8x32xf32> -> vector<8x32xf32>
    %570 = arith.truncf %569 : vector<8x32xf32> to vector<8x32xbf16>
    %c0_143 = arith.constant 0 : index
    %c0_144 = arith.constant 0 : index
    %571 = vector.load %arg12[%c0_143, %c0_144] : memref<32x32xbf16, #tpu.memory_space<vmem>>, vector<32x32xbf16>
    %cst_145 = arith.constant dense<0.000000e+00> : vector<8x32xf32>
    %572 = tpu.matmul %570, %571, %cst_145 {dimension_numbers = #tpu.dot_dimension_numbers<[1], [0], [0], [1], [0, 0, 1, 1], [], []>} : vector<8x32xbf16>, vector<32x32xbf16>, vector<8x32xf32> -> vector<8x32xf32>
    %c0_146 = arith.constant 0 : index
    %c0_147 = arith.constant 0 : index
    %573 = vector.load %arg13[%c0_146, %c0_147] : memref<32x32xbf16, #tpu.memory_space<vmem>>, vector<32x32xbf16>
    %cst_148 = arith.constant dense<0.000000e+00> : vector<8x32xf32>
    %574 = tpu.matmul %552, %573, %cst_148 {dimension_numbers = #tpu.dot_dimension_numbers<[1], [0], [0], [1], [0, 0, 1, 1], [], []>} : vector<8x32xbf16>, vector<32x32xbf16>, vector<8x32xf32> -> vector<8x32xf32>
    %575 = arith.addf %572, %574 : vector<8x32xf32>
    %c0_149 = arith.constant 0 : index
    %c0_150 = arith.constant 0 : index
    %576 = vector.load %arg14[%c0_149, %c0_150] : memref<1x32xf32, #tpu.memory_space<vmem>>, vector<1x32xf32>
    %577 = vector.broadcast %576 : vector<1x32xf32> to vector<8x32xf32>
    %578 = arith.addf %575, %577 : vector<8x32xf32>
    %579 = math.tanh %578 : vector<8x32xf32>
    %580 = arith.truncf %579 : vector<8x32xf32> to vector<8x32xbf16>
    %c0_151 = arith.constant 0 : index
    %c0_152 = arith.constant 0 : index
    %581 = vector.load %arg15[%c0_151, %c0_152] : memref<32x128xbf16, #tpu.memory_space<vmem>>, vector<32x128xbf16>
    %cst_153 = arith.constant dense<0.000000e+00> : vector<8x128xf32>
    %582 = tpu.matmul %580, %581, %cst_153 {dimension_numbers = #tpu.dot_dimension_numbers<[1], [0], [0], [1], [0, 0, 1, 1], [], []>} : vector<8x32xbf16>, vector<32x128xbf16>, vector<8x128xf32> -> vector<8x128xf32>
    %c0_154 = arith.constant 0 : index
    %c0_155 = arith.constant 0 : index
    %583 = vector.load %arg16[%c0_154, %c0_155] : memref<1x128xf32, #tpu.memory_space<vmem>>, vector<1x128xf32>
    %584 = vector.broadcast %583 : vector<1x128xf32> to vector<8x128xf32>
    %585 = arith.addf %582, %584 : vector<8x128xf32>
    %c0_156 = arith.constant 0 : index
    %c0_157 = arith.constant 0 : index
    %c0_158 = arith.constant 0 : index
    %586 = vector.load %arg17[%c0_156, %c0_157, %c0_158] : memref<1x8x128xf32, #tpu.memory_space<vmem>>, vector<1x8x128xf32>
    %587 = vector.shape_cast %586 : vector<1x8x128xf32> to vector<8x128xf32>
    %588 = vector.shape_cast %585 : vector<8x128xf32> to vector<1x8x128xf32>
    tpu.vector_store %arg17[%c0_156, %c0_157, %c0_158], %588 {strides = array<i32>} : memref<1x8x128xf32, #tpu.memory_space<vmem>>, vector<1x8x128xf32>,
    return
  }
  func.func @transform_0(%arg0: i32) -> (i32, i32, i32) {
    %c0_i32 = arith.constant 0 : i32
    %c0_i32_0 = arith.constant 0 : i32
    %c0_i32_1 = arith.constant 0 : i32
    return %arg0, %c0_i32, %c0_i32_0 : i32, i32, i32
  }
  func.func @transform_1(%arg0: i32) -> (i32, i32, i32) {
    %c0_i32 = arith.constant 0 : i32
    %c0_i32_0 = arith.constant 0 : i32
    %c0_i32_1 = arith.constant 0 : i32
    return %arg0, %c0_i32, %c0_i32_0 : i32, i32, i32
  }
  func.func @transform_2(%arg0: i32) -> (i32, i32, i32) {
    %c0_i32 = arith.constant 0 : i32
    %c0_i32_0 = arith.constant 0 : i32
    %c0_i32_1 = arith.constant 0 : i32
    return %arg0, %c0_i32, %c0_i32_0 : i32, i32, i32
  }
  func.func @transform_3(%arg0: i32) -> (i32, i32) {
    %c0_i32 = arith.constant 0 : i32
    %c0_i32_0 = arith.constant 0 : i32
    %c0_i32_1 = arith.constant 0 : i32
    return %c0_i32, %c0_i32_0 : i32, i32
  }
  func.func @transform_4(%arg0: i32) -> (i32, i32) {
    %c0_i32 = arith.constant 0 : i32
    %c0_i32_0 = arith.constant 0 : i32
    %c0_i32_1 = arith.constant 0 : i32
    return %c0_i32, %c0_i32_0 : i32, i32
  }
  func.func @transform_5(%arg0: i32) -> (i32, i32) {
    %c0_i32 = arith.constant 0 : i32
    %c0_i32_0 = arith.constant 0 : i32
    %c0_i32_1 = arith.constant 0 : i32
    return %c0_i32, %c0_i32_0 : i32, i32
  }
  func.func @transform_6(%arg0: i32) -> (i32, i32) {
    %c0_i32 = arith.constant 0 : i32
    %c0_i32_0 = arith.constant 0 : i32
    %c0_i32_1 = arith.constant 0 : i32
    return %c0_i32, %c0_i32_0 : i32, i32
  }
  func.func @transform_7(%arg0: i32) -> (i32, i32) {
    %c0_i32 = arith.constant 0 : i32
    %c0_i32_0 = arith.constant 0 : i32
    %c0_i32_1 = arith.constant 0 : i32
    return %c0_i32, %c0_i32_0 : i32, i32
  }
  func.func @transform_8(%arg0: i32) -> (i32, i32) {
    %c0_i32 = arith.constant 0 : i32
    %c0_i32_0 = arith.constant 0 : i32
    %c0_i32_1 = arith.constant 0 : i32
    return %c0_i32, %c0_i32_0 : i32, i32
  }
  func.func @transform_9(%arg0: i32) -> (i32, i32) {
    %c0_i32 = arith.constant 0 : i32
    %c0_i32_0 = arith.constant 0 : i32
    %c0_i32_1 = arith.constant 0 : i32
    return %c0_i32, %c0_i32_0 : i32, i32
  }
  func.func @transform_10(%arg0: i32) -> (i32, i32) {
    %c0_i32 = arith.constant 0 : i32
    %c0_i32_0 = arith.constant 0 : i32
    %c0_i32_1 = arith.constant 0 : i32
    return %c0_i32, %c0_i32_0 : i32, i32
  }
  func.func @transform_11(%arg0: i32) -> (i32, i32) {
    %c0_i32 = arith.constant 0 : i32
    %c0_i32_0 = arith.constant 0 : i32
    %c0_i32_1 = arith.constant 0 : i32
    return %c0_i32, %c0_i32_0 : i32, i32
  }
  func.func @transform_12(%arg0: i32) -> (i32, i32) {
    %c0_i32 = arith.constant 0 : i32
    %c0_i32_0 = arith.constant 0 : i32
    %c0_i32_1 = arith.constant 0 : i32
    return %c0_i32, %c0_i32_0 : i32, i32
  }
  func.func @transform_13(%arg0: i32) -> (i32, i32) {
    %c0_i32 = arith.constant 0 : i32
    %c0_i32_0 = arith.constant 0 : i32
    %c0_i32_1 = arith.constant 0 : i32
    return %c0_i32, %c0_i32_0 : i32, i32
  }
  func.func @transform_14(%arg0: i32) -> (i32, i32) {
    %c0_i32 = arith.constant 0 : i32
    %c0_i32_0 = arith.constant 0 : i32
    %c0_i32_1 = arith.constant 0 : i32
    return %c0_i32, %c0_i32_0 : i32, i32
  }
  func.func @transform_15(%arg0: i32) -> (i32, i32) {
    %c0_i32 = arith.constant 0 : i32
    %c0_i32_0 = arith.constant 0 : i32
    %c0_i32_1 = arith.constant 0 : i32
    return %c0_i32, %c0_i32_0 : i32, i32
  }
  func.func @transform_16(%arg0: i32) -> (i32, i32, i32) {
    %c0_i32 = arith.constant 0 : i32
    %c0_i32_0 = arith.constant 0 : i32
    %c0_i32_1 = arith.constant 0 : i32
    return %arg0, %c0_i32, %c0_i32_0 : i32, i32, i32
  }
}

</mosaic_0001>

<bundles_post_ra>
// kernel: tpu_custom_call.1
= control target key start
LH: loop header
LB: loop body
LE: loop exit
PB: predicated region body
PF: predicated region fallthrough
CT: control target
= control target key end

     0   :  { %s3628_s0 = inlined_call_operand.hbm [shape: bf16[2,8,32], index: 0, kind: input, shape index: {}]   ;;  %s3629_s1 = inlined_call_operand.hbm [shape: bf16[2,8,32], index: 1, kind: input, shape index: {}]   ;;  %s3630_s2 = inlined_call_operand.hbm [shape: f32[2,1,8], index: 2, kind: input, shape index: {}]   ;;  %s3631_s3 = inlined_call_operand.hbm [shape: bf16[32,128], index: 3, kind: input, shape index: {}]   ;;  %s3632_s4 = inlined_call_operand.hbm [shape: bf16[32,128], index: 4, kind: input, shape index: {}]   ;;  %s3633_s5 = inlined_call_operand.vmem [shape: f32[1,128], index: 5, kind: input, shape index: {}]   ;;  %s3634_s6 = inlined_call_operand.vmem [shape: f32[1,128], index: 6, kind: input, shape index: {}]   ;;  %s3635_s7 = inlined_call_operand.hbm [shape: bf16[32,128], index: 7, kind: input, shape index: {}]   ;;  %s3636_s8 = inlined_call_operand.hbm [shape: bf16[32,128], index: 8, kind: input, shape index: {}]   ;;  %s3637_s9 = inlined_call_operand.vmem [shape: f32[1,128], index: 9, kind: input, shape index: {}]   ;;  %s3638_s10 = inlined_call_operand.vmem [shape: f32[1,128], index: 10, kind: input, shape index: {}]   ;;  %s3639_s11 = inlined_call_operand.hbm [shape: bf16[32,32], index: 11, kind: input, shape index: {}]   ;;  %s3640_s12 = inlined_call_operand.hbm [shape: bf16[32,32], index: 12, kind: input, shape index: {}]   ;;  %s3641_s13 = inlined_call_operand.vmem [shape: f32[1,32], index: 13, kind: input, shape index: {}]   ;;  %s3642_s14 = inlined_call_operand.hbm [shape: bf16[32,128], index: 14, kind: input, shape index: {}]   ;;  %s3643_s15 = inlined_call_operand.vmem [shape: f32[1,128], index: 15, kind: input, shape index: {}]   ;;  %s3644_s16 = inlined_call_operand.hbm [shape: f32[2,8,128], index: 16, kind: output, shape index: {}]  }
   0x1   :  { %3660 = sst [smem:[#allocation37_spill]] %s3628_s0 }
   0x2   :  { %3661 = sst [smem:[#allocation38_spill]] %s3629_s1 }
   0x3   :  { %3662 = sst [smem:[#allocation39_spill]] %s3631_s3 }
   0x4   :  { %3663 = sst [smem:[#allocation40_spill]] %s3632_s4 }
   0x5   :  { %3664 = sst [smem:[#allocation41_spill]] %s3635_s7 }
   0x6   :  { %3665 = sst [smem:[#allocation42_spill]] %s3637_s9 }
   0x7   :  { %3666 = sst [smem:[#allocation43_spill]] %s3638_s10 }
   0x8   :  { %3667 = sst [smem:[#allocation44_spill]] %s3639_s11 }
   0x9   :  { %3668 = sst [smem:[#allocation45_spill]] %s3641_s13 }
   0xa   :  { %3669 = sst [smem:[#allocation46_spill]] %s3643_s15 }
   0xb   :  { %3670 = sst [smem:[#allocation47_spill]] %s3644_s16 }
   0xc   :  { %21 = vsyncpa [#allocation7], 0 }
   0xd   :  { %23 = vsyncpa [#allocation7 + $0x1], 0 }
   0xe   :  { %24 = vsyncpa [#allocation10], 0 }
   0xf   :  { %26 = vsyncpa [#allocation10 + $0x1], 0 }
  0x10   :  { %27 = vsyncpa [#allocation13], 0 }
  0x11   :  { %28 = vsyncpa [#allocation16], 0 }
  0x12   :  { %29 = vsyncpa [#allocation19], 0 }
  0x13   :  { %30 = vsyncpa [#allocation22], 0 }
  0x14   :  { %31 = vsyncpa [#allocation8], 0 }
  0x15   :  { %33 = vsyncpa [#allocation8 + $0x1], 0  ;;  %s3093_s21 = smov 0   ;;  %s3095_s22 = smov 0  }
  0x16   :  { %s3097_s23 = smov 0   ;;  %s3099_s24 = smov 0  }
  0x17 LB: > { %3671 = sst [smem:[#allocation31_spill]] %s2982_s21  ;;  %s3117_s28 = sadd.s32 4294967295, %s2994_s24   ;;  %s2994_s24 = sphi %s3099_s24, %s3709_s24   ;;  %s2990_s23 = sphi %s3097_s23, %s3711_s23   ;;  %s2986_s22 = sphi %s3095_s22, %s3713_s22   ;;  %s2982_s21 = sphi %s3093_s21, %s3712_s21  }
  0x18   : > { %3672 = sst [smem:[#allocation32_spill]] %s2990_s23  ;;  %p2233_p0 = scmp.ge.s32.totalorder %s2994_s24, 1 }
  0x19   : > { %s3673_s3 = sld [smem:[#allocation39_spill]]  ;;  %p3659_p1 = scmp.eq.s32.totalorder %s3117_s28, 0 }
  0x1a   : > { %p421_p2 = scmp.lt.s32.totalorder %s2994_s24, 3  ;;  %s2996_s30 = smov [#allocation12]  }
  0x1b   : > { %s434_s0 = sshll.u32 %s2996_s30, 4  ;;  %s3675_s7 = sld [smem:[#allocation41_spill]]  ;;  %s435_s0 = int_to_ptr.vmem [resolvable:$true] %s434_s0 }
  0x1c   : > { %p3122_p3 = pnand %p2233_p0, %p421_p2  ;;  %s3677_s11 = sld [smem:[#allocation44_spill]] }
  0x1d   : > { %s3646_s18 = smov 64   ;;  %s46_s26 = sadd.s32 1, %s2990_s23 }
  0x1e   : > { %p2405_p4 = pneg %p3122_p3  ;;  %p53_p7 = scmp.ne.s32.totalorder %s2990_s23, %s2986_s22 }
  0x1f   : > { %s432_s27 = sshll.u32 %s3673_s3, 4  ;;  %s2997_s3 = smov [#allocation15]   ;;  %s433_s27 = int_to_ptr.hbm [resolvable:$true] %s432_s27 }
  0x20   : > { %p3134_p6 = pnand %p2405_p4, %p3659_p1  ;;  %s468_s17 = sshll.u32 %s2997_s3, 4  ;;  %s469_s17 = int_to_ptr.vmem [resolvable:$true] %s468_s17 }
  0x21   : > { %s466_s19 = sshll.u32 %s3675_s7, 4  ;;  %s3648_s7 = smov 4   ;;  %s467_s19 = int_to_ptr.hbm [resolvable:$true] %s466_s19 }
  0x22   : > { %s500_s30 = sshll.u32 %s3677_s11, 4  ;;  %s3000_s3 = smov [#allocation18]   ;;  %s501_s30 = int_to_ptr.hbm [resolvable:$true] %s500_s30 }
  0x23   : > { %2408 = dma.hbm_to_vmem [thread:$0]  (!%p3134_p6), %s433_s27, 256, %s435_s0, [#allocation13], %s3646_s18, %s3646_s18, %s3648_s7  }
  0x24   : > { %2414 = dma.hbm_to_vmem [thread:$0]  (!%p3134_p6), %s467_s19, 256, %s469_s17, [#allocation16], %s3646_s18, %s3646_s18, %s3648_s7  }
  0x25   : > { %s502_s25 = sshll.u32 %s3000_s3, 4  ;;  %s2232_s27 = sadd.s32 4294967294, %s2994_s24   ;;  %s503_s25 = int_to_ptr.vmem [resolvable:$true] %s502_s25 }
  0x26   : > { %2420 = dma.hbm_to_vmem [thread:$0]  (!%p3134_p6), %s501_s30, 256, %s503_s25, [#allocation19], %s3646_s18, %s3646_s18, %s3648_s7  }
  0x27   : > { %s3158_s0 = sadd.s32 1, %s2994_s24   ;;  %p54_p9 = scmp.eq.s32.totalorder %s2994_s24, 0 }
  0x28   : > { %3678 = sst [smem:[#allocation33_spill]] %s3158_s0  ;;  %s43_s11 = ssub.s32 %s2994_s24, %s3158_s0 }
  0x29   : > { %p44_p8 = scmp.eq.s32.totalorder %s43_s11, 0  ;;  %p59_p10 = scmp.ne.s32.totalorder %s2986_s22, %s2982_s21 }
  0x2a   : > { %p408_p11 = scmp.eq.s32.totalorder %s3117_s28, 1  ;;  %p55_p12 = por %p54_p9, %p53_p7 }
  0x2b   : > { %s3170_s19 = scalar_select %p44_p8, %s2990_s23, %s46_s26  }
  0x2c   : > { %p3174_p13 = por %p3659_p1, %p59_p10  ;;  %p3178_p0 = por %p408_p11, %p53_p7 }
  0x2d   : > { %3679 = sst [smem:[#allocation34_spill]] %s3170_s19  ;;  %p414_p2 = scmp.eq.s32.totalorder %s2232_s27, 1 }
  0x2e   : > { %s3681_s17 = scalar_select %p3178_p0, 1, 0 }
  0x2f   : > { %p2448_p4 = scmp.lt.s32.totalorder %s2994_s24, 2  ;;  %s3184_s3 = sand.u32 1, %s2990_s23  }
  0x30   : > { %3682 = sst [smem:[#allocation35_spill]] %s3681_s17  ;;  %p3186_p5 = por %p414_p2, %p59_p10 }
  0x31   : > { %s3658_s25 = sshll.u32 %s3184_s3, 2  ;;  %s2243_s26 = sshll.u32 %s2994_s24, 2 }
  0x32   : > { %s3683_s11 = scalar_select %p3186_p5, 1, 0 }
  0x33   : > { %p3192_p8 = pnand %p2448_p4, %p55_p12  ;;  %s569_s7 = sand.u32 1, %s2994_s24  }
  0x34   : > { %3684 = sst [smem:[#allocation36_spill]] %s3683_s11  ;;  %s573_s0 = scalar_lea.vmem [#allocation9], %s3658_s25 }
  0x35   : > { %s3686_s1 = sld [smem:[#allocation38_spill]]  ;;  %s581_s21 = sshll.u32 %s573_s0, 4  ;;  %s582_s21 = int_to_ptr.vmem [resolvable:$true] %s581_s21 }
  0x36   : > { %s3687_s4 = sld [smem:[#allocation40_spill]]  ;;  %s3207_s13 = scalar_lea.sflag [#allocation10], %s569_s7 }
  0x37   : > { %p2702_p9 = pneg %p3192_p8 }
  0x3b   : > { %s577_s23 = scalar_lea.hbm %s3686_s1, %s2243_s26  ;;  %s2705_s19 = scalar_lea.hbm %s3686_s1, 8 }
  0x3c   : > { %s579_s15 = sshll.u32 %s577_s23, 4  ;;  %s446_s16 = sshll.u32 %s3687_s4, 4  ;;  %s580_s15 = int_to_ptr.hbm [resolvable:$true] %s579_s15  ;;  %s447_s16 = int_to_ptr.hbm [resolvable:$true] %s446_s16 }
  0x3d   : > { %s2698_s10 = sshra.s32 %s580_s15, 4  ;;  %s2699_s10 = int_to_ptr.hbm [resolvable:$true] %s2698_s10 }
  0x3e   : > { %s2700_s9 = scalar_lea.hbm %s2699_s10, 4  ;;  %p2706_p12 = scmp.lt.s32.totalorder %s2699_s10, %s3686_s1 }
  0x3f   : > { %p2701_p7 = scmp.ne.s32.totalorder %s2699_s10, %s2700_s9  ;;  %p2707_p2 = scmp.lt.s32.totalorder %s2705_s19, %s2700_s9 }
  0x41   : > { %p2703_p10 = pnand %p2702_p9, %p2701_p7  ;;  %p2708_p4 = por %p2707_p2, %p2706_p12 }
  0x43   : > { %p2704_p11 = pneg %p2703_p10 }
  0x45   : > { %p2709_p1 = pnand %p2708_p4, %p2704_p11 }
  0x47   : > { %2712 = shalt.err (!%p2709_p1)
}
  0x48   : > { %2433 = dma.hbm_to_vmem [thread:$0]  (!%p3192_p8), %s580_s15, 64, %s582_s21, %s3207_s13  }
  0x49   : > { %s3001_s7 = smov [#allocation14]   ;;  %s480_s23 = sshll.u32 %s3636_s8, 4  ;;  %s481_s23 = int_to_ptr.hbm [resolvable:$true] %s480_s23 }
  0x4a   : > { %s448_s17 = sshll.u32 %s3001_s7, 4  ;;  %s3688_s9 = smov 4   ;;  %s449_s17 = int_to_ptr.vmem [resolvable:$true] %s448_s17 }
  0x4b   : > { %s3689_s10 = smov 64   ;;  %s514_s15 = sshll.u32 %s3640_s12, 4  ;;  %s515_s15 = int_to_ptr.hbm [resolvable:$true] %s514_s15 }
  0x4c   : > { %2411 = dma.hbm_to_vmem [thread:$0]  (!%p3134_p6), %s447_s16, 256, %s449_s17, [#allocation13], %s3689_s10, %s3689_s10, %s3688_s9  }
  0x4d   : > { %s3002_s21 = smov [#allocation17]   ;;  %s3003_s7 = smov [#allocation20]  }
  0x4e   : > { %s482_s27 = sshll.u32 %s3002_s21, 4  ;;  %s516_s11 = sshll.u32 %s3003_s7, 4  ;;  %s483_s27 = int_to_ptr.vmem [resolvable:$true] %s482_s27  ;;  %s517_s11 = int_to_ptr.vmem [resolvable:$true] %s516_s11 }
  0x4f   : > { %2417 = dma.hbm_to_vmem [thread:$0]  (!%p3134_p6), %s481_s23, 256, %s483_s27, [#allocation16], %s3689_s10, %s3689_s10, %s3688_s9  }
  0x50   : > { %s531_s0 = sshll.u32 %s3642_s14, 4  ;;  %s3004_s25 = smov [#allocation21]   ;;  %s532_s0 = int_to_ptr.hbm [resolvable:$true] %s531_s0 }
  0x51   : > { %2423 = dma.hbm_to_vmem [thread:$0]  (!%p3134_p6), %s515_s15, 256, %s517_s11, [#allocation19], %s3689_s10, %s3689_s10, %s3688_s9  }
  0x52   : > { %s533_s19 = sshll.u32 %s3004_s25, 4  ;;  %s3690_s27 = sld [smem:[#allocation37_spill]]  ;;  %s534_s19 = int_to_ptr.vmem [resolvable:$true] %s533_s19 }
  0x53   : > { %2426 = dma.hbm_to_vmem [thread:$0]  (!%p3134_p6), %s532_s0, 256, %s534_s19, [#allocation22], %s3689_s10, %s3689_s10, %s3688_s9  }
  0x54   : > { %s3691_s17 = sshll.u32 %s3184_s3, 2  ;;  %s551_s15 = scalar_lea.sflag [#allocation7], %s3184_s3 }
  0x55   : > { %s554_s1 = scalar_lea.vmem [#allocation6], %s3691_s17 }
  0x56   : > { %s562_s4 = sshll.u32 %s554_s1, 4  ;;  %s563_s4 = int_to_ptr.vmem [resolvable:$true] %s562_s4 }
  0x58   : > { %s558_s7 = scalar_lea.hbm %s3690_s27, %s2243_s26  ;;  %s2855_s23 = scalar_lea.hbm %s3690_s27, 8 }
  0x59   : > { %s560_s16 = sshll.u32 %s558_s7, 4  ;;  %s561_s16 = int_to_ptr.hbm [resolvable:$true] %s560_s16 }
  0x5a   : > { %s2848_s11 = sshra.s32 %s561_s16, 4  ;;  %s2849_s11 = int_to_ptr.hbm [resolvable:$true] %s2848_s11 }
  0x5b   : > { %s2850_s25 = scalar_lea.hbm %s2849_s11, 4  ;;  %p2856_p6 = scmp.lt.s32.totalorder %s2849_s11, %s3690_s27 }
  0x5c   : > { %p2851_p1 = scmp.ne.s32.totalorder %s2849_s11, %s2850_s25  ;;  %p2857_p11 = scmp.lt.s32.totalorder %s2855_s23, %s2850_s25 }
  0x5e   : > { %p2853_p7 = pnand %p2851_p1, %p2702_p9  ;;  %p2858_p12 = por %p2857_p11, %p2856_p6 }
  0x60   : > { %p2854_p10 = pneg %p2853_p7 }
  0x62   : > { %p2859_p2 = pnand %p2858_p12, %p2854_p10 }
  0x64   : > { %2862 = shalt.err (!%p2859_p2)
}
  0x65   : > { %2430 = dma.hbm_to_vmem [thread:$0]  (!%p3192_p8), %s561_s16, 64, %s563_s4, %s551_s15  }
  0x66   : > { %s594_s19 = scalar_lea.hbm %s3630_s2, %s2994_s24  ;;  %s591_s7 = scalar_lea.vmem [#allocation11], %s3184_s3 }
  0x67   : > { %s596_s21 = sshll.u32 %s594_s19, 4  ;;  %s598_s17 = sshll.u32 %s591_s7, 4  ;;  %s597_s21 = int_to_ptr.hbm [resolvable:$true] %s596_s21  ;;  %s599_s17 = int_to_ptr.vmem [resolvable:$true] %s598_s17 }
  0x68   : > { %s2878_s11 = sshra.s32 %s597_s21, 4  ;;  %s2885_s4 = scalar_lea.hbm %s3630_s2, 2  ;;  %s2879_s11 = int_to_ptr.hbm [resolvable:$true] %s2878_s11 }
  0x69   : > { %s2880_s25 = scalar_lea.hbm %s2879_s11, 1  ;;  %p2886_p10 = scmp.lt.s32.totalorder %s2879_s11, %s3630_s2 }
  0x6a   : > { %p2881_p4 = scmp.ne.s32.totalorder %s2879_s11, %s2880_s25  ;;  %p2887_p6 = scmp.lt.s32.totalorder %s2885_s4, %s2880_s25 }
  0x6c   : > { %p2883_p1 = pnand %p2881_p4, %p2702_p9  ;;  %p2888_p11 = por %p2887_p6, %p2886_p10 }
  0x6e   : > { %p2884_p7 = pneg %p2883_p1 }
  0x70   : > { %p2889_p12 = pnand %p2888_p11, %p2884_p7 }
  0x72   : > { %2892 = shalt.err (!%p2889_p12)
}
  0x73   : > { %2436 = dma.hbm_to_vmem [thread:$0]  (!%p3192_p8), %s597_s21, 16, %s599_s17, %s3207_s13  }
  0x74   : > { %607 = sbr.rel (%p3122_p3) target bundleno = 10181 (0x27c5), region = 84  ;;  %s3291_s3 = sand.u32 (!%p3122_p3), 1, %s2986_s22  }
  0x75   : > { %s2247_s23 = sshll.u32 (!%p3122_p3), %s3291_s3, 2  ;;  %s610_s9 = scalar_lea.sflag (!%p3122_p3), [#allocation7], %s3291_s3 }
  0x76   : > { %s613_s10 = scalar_lea.vmem (!%p3122_p3), [#allocation6], %s2247_s23 }
  0x79   : > { %2953 = dma.done.wait (%p3174_p13), %s610_s9, 64  }
  0x7a   : > { %2955 = vsyncadd (%p3174_p13), %s610_s9, 4294967232  ;;  %s619_s13 = sand.u32 1, %s3117_s28   ;;  %s3300_s29 = scalar_lea.vmem [#allocation9], %s2247_s23 }
  0x7b   : > { %s620_s18 = scalar_lea.sflag [#allocation10], %s619_s13 }
  0x7c   : > { %2957 = dma.done.wait (%p3174_p13), %s620_s18, 80  }
  0x7d   : > { %2959 = vsyncadd (%p3174_p13), %s620_s18, 4294967216  ;;  %s632_s1 = scalar_lea.vmem [#allocation11], %s3291_s3  ;;  %p3692_p3 = scmp.eq.s32.totalorder %s3117_s28, 0 }
  0x7f   : > { %2961 = dma.done.wait (%p3692_p3), [#allocation13], 512   ;;  %p3693_p8 = pmov %p3692_p3 }
  0x80   : > { %p3694_p9 = pmov %p3692_p3 }
  0x81   : > { %2963 = vsyncadd (%p3693_p8), [#allocation13], 4294966784 }
  0x82   : > { %2965 = dma.done.wait (%p3694_p9), [#allocation16], 512   ;;  %p3695_p2 = pmov %p3692_p3 }
  0x84   : > { %2967 = vsyncadd (%p3695_p2), [#allocation16], 4294966784  ;;  %p3696_p4 = pmov %p3695_p2 }
  0x85   : > { %p3697_p1 = pmov %p3695_p2 }
  0x86   : > { %2969 = dma.done.wait (%p3696_p4), [#allocation19], 512  }
  0x87   : > { %2971 = vsyncadd (%p3697_p1), [#allocation19], 4294966784  ;;  %p3698_p13 = pmov %p3697_p1 }
  0x88   : > { %p3699_p7 = pmov %p3697_p1 }
  0x89   : > { %2973 = dma.done.wait (%p3698_p13), [#allocation22], 256  }
  0x8a   : > { %2975 = vsyncadd (%p3699_p7), [#allocation22], 4294967040  ;;  %v2356_v0 = vld [vmem:[#allocation12 + $0x8] sm:$0xff]  ;;  %v3323_v1 = vld [vmem:[#allocation14 + $0x8] sm:$0xff]  ;;  %vm748_vm0 = vcmask 261120   ;;  %v3005_v5 = vmov 0  }
  0x8b   : > { %v2355_v2 = vld [vmem:[#allocation12] sm:$0xff]  ;;  %758 = vmatpush.bf16.msra.mxu0 %v2356_v0  ;;  %836 = vmatpush.bf16.msra.mxu2 %v3323_v1  ;;  %v3326_v3 = vld [vmem:[#allocation14] sm:$0xff]  ;;  %v2501_v6 = vld [vmem:[%s3633_s5] ss:$0 sm:$0xff]  ;;  %s3006_s7 = smov 64   ;;  %s3007_s17 = smov 96  }
  0x8c   : > { %902 = vmatpush.bf16.msra.mxu3 %v3323_v1  ;;  %v727_v4 = vld [vmem:[%s613_s10] sm:$0xf]  ;;  %s3700_s20 = sld [smem:[#allocation42_spill]]  ;;  %s2352_s10 = sshll.u32 %s3117_s28, 3 }
  0x8d   : > { %v3346_v9 = vld [vmem:[%s3634_s6] sm:$0x1]  ;;  %s3701_s16 = sld [smem:[#allocation43_spill]]  ;;  %s2256_s13 = sshll.u32 %s3291_s3, 3 }
  0x8e   : > { %s3702_s9 = sld [smem:[#allocation45_spill]] }
  0x8f   : > { %759 = vmatpush.bf16.msra.mxu0 %v2355_v2  ;;  %837 = vmatpush.bf16.msra.mxu2 %v3326_v3 }
  0x90   : > { %903 = vmatpush.bf16.msra.mxu3 %v3326_v3 }
  0x92   : > { %2265 = vmatmul.msk.bf16.vlgmr.msra.gmra.mxu0 %vm748_vm0, %v727_v4  ;;  %838 = vmatmul.bf16.vlgmr.msra.gmra.mxu2 %v3005_v5 }
  0x93   : > { %967 = vmatpush.bf16.msrb.mxu0 %v3323_v1  ;;  %1097 = vmatpush.bf16.msrb.mxu2 %v3323_v1 }
  0x94   : > { %1162 = vmatpush.bf16.msrb.mxu3 %v3323_v1 }
  0x97   : > { %968 = vmatpush.bf16.msrb.mxu0 %v3326_v3  ;;  %1098 = vmatpush.bf16.msrb.mxu2 %v3326_v3 }
  0x98   : > { %1163 = vmatpush.bf16.msrb.mxu3 %v3326_v3 }
  0x9b   : > { %1227 = vmatpush.bf16.msra.mxu0 %v3323_v1 }
  0x9f   : > { %1228 = vmatpush.bf16.msra.mxu0 %v3326_v3 }
 0x10f   : > { %v761_v7 = vpop.f32.mrf.mxu0 }
 0x110   : > { %v762_v8 = vadd.f32 %v2501_v6, %v761_v7 }
 0x112   : > { %765 = vst [vmem:[#allocation2] sm:$0xff] %v762_v8 }
 0x115   : > { %v839_v10 = vpop.f32.mrf.mxu2 }
 0x116   : > { %v840_v11 = vadd.f32 %v839_v10, %v3346_v9 }
 0x117   : > { %v763_v12 = vpop.f32.mrf.mxu0 }
 0x118   : > { %864 = vrot.lane.b32.xlu0 %v840_v11, %s3006_s7 }
 0x119   : > { %v814_v14 = vld [vmem:[#allocation2] sm:$0x1]  ;;  %v888_v44 = vld [vmem:[#allocation2 + $0x1] sm:$0x1] }
 0x11a   : > { %v843_v15 = vadd.f32 %v840_v11, %v814_v14 }
 0x11c   : > { %v2283_v16 = vmul.f32 -1.442695, %v843_v15 }
 0x11d   : > { %v841_v13 = vpop.f32.mrf.mxu2 }
 0x11e   : > { %2506 = vpow2.f32 %v2283_v16  ;;  %v953_v13 = vld [vmem:[#allocation2 + $0x2] sm:$0x1] }
 0x124   : > { %v2507_v17 = vpop.eup %2506 }
 0x125   : > { %v847_v18 = vadd.f32 1.0, %v2507_v17 }
 0x127   : > { %2508 = vrcp.f32 %v847_v18  ;;  %v859_v24 = vand.u32 2147483648, %v847_v18  ;;  %vm853_vm2 = vweird.f32 %v847_v18  ;;  %v857_v25 = vand.u32 2147483647, %v847_v18 }
 0x129   : > { %v860_v27 = vor.u32 1.1754944e-38, %v859_v24  ;;  %vm858_vm4 = vcmp.eq.f32.partialorder %v857_v25, 8.507059e+37 }
 0x12d   : > { %v2509_v19 = vpop.eup %2508 }
 0x12e   : > { %v849_v20 = vmul.f32 %v2509_v19, %v847_v18  ;;  %vm854_vm1 = vweird.f32 %v2509_v19 }
 0x12f   : > { %vm855_vm3 = vmor %vm853_vm2, %vm854_vm1 }
 0x130   : > { %v850_v21 = vsub.f32 1.0, %v849_v20 }
 0x132   : > { %v851_v22 = vmul.f32 %v2509_v19, %v850_v21 }
 0x134   : > { %v852_v23 = vadd.f32 %v2509_v19, %v851_v22 }
 0x136   : > { %v856_v26 = vsel %vm855_vm3, %v2509_v19, %v852_v23 }
 0x137   : > { %v861_v29 = vsel %vm858_vm4, %v860_v27, %v856_v26 }
 0x138   : > { %v874_v34 = vsub.f32 1.0, %v861_v29  ;;  %v880_v36 = vmul.f32 0.0, %v861_v29 }
 0x18a   : > { %v865_v28 = vpop.permute.xlu0 %864 }
 0x18b   : > { %v867_v30 = vmul.f32 %v865_v28, %v861_v29 }
 0x18d   : > { %869 = vrot.lane.b32.xlu0 %v867_v30, %s3006_s7 }
 0x1ff   : > { %v870_v31 = vpop.permute.xlu0 %869 }
 0x200   : > { %v872_v32 = vadd.f32 %v870_v31, %v814_v14 }
 0x202   : > { %2510 = vtanh.f32 %v872_v32 }
 0x208   : > { %v2511_v33 = vpop.eup %2510 }
 0x209   : > { %876 = vrot.lane.b32.xlu1 %v2511_v33, %s3007_s17  ;;  %v2358_v33 = vld [vmem:[#allocation15 + $0x8] sm:$0xff] }
 0x20a   : > { %796 = vmatpush.bf16.msra.mxu1 %v2358_v33 }
 0x27b   : > { %v877_v35 = vpop.permute.xlu1 %876 }
 0x27c   : > { %v879_v37 = vmul.f32 %v877_v35, %v874_v34  ;;  %v2357_v34 = vld [vmem:[#allocation15] sm:$0xff]  ;;  %v766_v35 = vld [vmem:[%s3300_s29] sm:$0xf] }
 0x27d   : > { %797 = vmatpush.bf16.msra.mxu1 %v2357_v34 }
 0x27e   : > { %v3352_v38 = vadd.f32 %v880_v36, %v879_v37 }
 0x280   : > { %v889_v39 = vpack.c.bf16 %v3352_v38, %v3352_v38  ;;  %2274 = vmatmul.msk.bf16.vlgmr.msra.gmra.mxu1 %vm748_vm0, %v766_v35 }
 0x281   : > { %1032 = vmatpush.bf16.msrb.mxu1 %v3323_v1 }
 0x282   : > { %891 = vrot.lane.b32.xlu1 %v889_v39, %s3007_s17 }
 0x285   : > { %1033 = vmatpush.bf16.msrb.mxu1 %v3326_v3 }
 0x289   : > { %1292 = vmatpush.bf16.msra.mxu1 %v3323_v1  ;;  %v2502_v1 = vld [vmem:[%s3700_s20] ss:$0 sm:$0xff]  ;;  %s2041_s20 = scalar_lea.sflag [#allocation8], %s3291_s3 }
 0x28d   : > { %1293 = vmatpush.bf16.msra.mxu1 %v3326_v3 }
 0x2f4   : > { %v892_v40 = vpop.permute.xlu1 %891 }
 0x2f5   : > { %2284 = vmatmul.msk.bf16.vlgmr.msra.gmra.mxu3 %vm748_vm0, %v892_v40 }
 0x2fd   : > { %v799_v3 = vpop.f32.mrf.mxu1 }
 0x378   : > { %v905_v41 = vpop.f32.mrf.mxu3 }
 0x379   : > { %v906_v42 = vadd.f32 %v905_v41, %v3346_v9 }
 0x37b   : > { %930 = vrot.lane.b32.xlu2 %v906_v42, %s3006_s7  ;;  %v909_v45 = vadd.f32 %v906_v42, %v888_v44 }
 0x37d   : > { %v2285_v46 = vmul.f32 -1.442695, %v909_v45  ;;  %v801_v45 = vpop.f32.mrf.mxu1 }
 0x37f   : > { %2512 = vpow2.f32 %v2285_v46 }
 0x380   : > { %v907_v43 = vpop.f32.mrf.mxu3 }
 0x385   : > { %v2513_v47 = vpop.eup %2512 }
 0x386   : > { %v913_v48 = vadd.f32 1.0, %v2513_v47 }
 0x388   : > { %2514 = vrcp.f32 %v913_v48  ;;  %v925_v54 = vand.u32 2147483648, %v913_v48  ;;  %vm919_vm6 = vweird.f32 %v913_v48  ;;  %v923_v55 = vand.u32 2147483647, %v913_v48 }
 0x38a   : > { %v926_v57 = vor.u32 1.1754944e-38, %v925_v54  ;;  %vm924_vm8 = vcmp.eq.f32.partialorder %v923_v55, 8.507059e+37 }
 0x38e   : > { %v2515_v49 = vpop.eup %2514 }
 0x38f   : > { %v915_v50 = vmul.f32 %v2515_v49, %v913_v48  ;;  %vm920_vm5 = vweird.f32 %v2515_v49 }
 0x390   : > { %vm921_vm7 = vmor %vm919_vm6, %vm920_vm5 }
 0x391   : > { %v916_v51 = vsub.f32 1.0, %v915_v50 }
 0x393   : > { %v917_v52 = vmul.f32 %v2515_v49, %v916_v51 }
 0x395   : > { %v918_v53 = vadd.f32 %v2515_v49, %v917_v52 }
 0x397   : > { %v922_v56 = vsel %vm921_vm7, %v2515_v49, %v918_v53  ;;  %v1018_v49 = vld [vmem:[#allocation2 + $0x3] sm:$0x1] }
 0x398   : > { %v927_v59 = vsel %vm924_vm8, %v926_v57, %v922_v56 }
 0x399   : > { %v940_v0 = vsub.f32 1.0, %v927_v59  ;;  %v946_v4 = vmul.f32 %v927_v59, %v3352_v38 }
 0x3d5   : > { %v931_v58 = vpop.permute.xlu2 %930 }
 0x3d6   : > { %v933_v60 = vmul.f32 %v931_v58, %v927_v59 }
 0x3d8   : > { %935 = vrot.lane.b32.xlu2 %v933_v60, %s3006_s7 }
 0x432   : > { %v936_v61 = vpop.permute.xlu2 %935 }
 0x433   : > { %v938_v62 = vadd.f32 %v936_v61, %v888_v44  ;;  %v800_v44 = vadd.f32 %v2502_v1, %v799_v3 }
 0x435   : > { %2516 = vtanh.f32 %v938_v62  ;;  %803 = vst [vmem:[#allocation3] sm:$0xff] %v800_v44 }
 0x43b   : > { %v2517_v63 = vpop.eup %2516 }
 0x43c   : > { %942 = vrot.lane.b32.xlu0 %v2517_v63, %s3007_s17 }
 0x4ae   : > { %v943_v2 = vpop.permute.xlu0 %942 }
 0x4af   : > { %v945_v5 = vmul.f32 %v943_v2, %v940_v0 }
 0x4b1   : > { %v3363_v6 = vadd.f32 %v946_v4, %v945_v5 }
 0x4b3   : > { %v954_v7 = vpack.c.bf16 %v3363_v6, %v3363_v6 }
 0x4b5   : > { %956 = vrot.lane.b32.xlu1 %v954_v7, %s3007_s17 }
 0x527   : > { %v957_v8 = vpop.permute.xlu1 %956 }
 0x528   : > { %2286 = vmatmul.msk.bf16.vlgmr.msrb.gmra.mxu0 %vm748_vm0, %v957_v8 }
 0x5a5   : > { %v970_v10 = vpop.f32.mrf.mxu0 }
 0x5a6   : > { %v971_v11 = vadd.f32 %v970_v10, %v3346_v9 }
 0x5a8   : > { %995 = vrot.lane.b32.xlu2 %v971_v11, %s3006_s7  ;;  %v974_v14 = vadd.f32 %v971_v11, %v953_v13 }
 0x5aa   : > { %v2287_v15 = vmul.f32 -1.442695, %v974_v14 }
 0x5ac   : > { %2518 = vpow2.f32 %v2287_v15 }
 0x5ad   : > { %v972_v12 = vpop.f32.mrf.mxu0 }
 0x5b2   : > { %v2519_v16 = vpop.eup %2518 }
 0x5b3   : > { %v978_v17 = vadd.f32 1.0, %v2519_v16 }
 0x5b5   : > { %2520 = vrcp.f32 %v978_v17  ;;  %v990_v23 = vand.u32 2147483648, %v978_v17  ;;  %vm984_vm10 = vweird.f32 %v978_v17  ;;  %v988_v24 = vand.u32 2147483647, %v978_v17 }
 0x5b7   : > { %v991_v26 = vor.u32 1.1754944e-38, %v990_v23  ;;  %vm989_vm12 = vcmp.eq.f32.partialorder %v988_v24, 8.507059e+37 }
 0x5bb   : > { %v2521_v18 = vpop.eup %2520 }
 0x5bc   : > { %v980_v19 = vmul.f32 %v2521_v18, %v978_v17  ;;  %vm985_vm9 = vweird.f32 %v2521_v18 }
 0x5bd   : > { %vm986_vm11 = vmor %vm984_vm10, %vm985_vm9 }
 0x5be   : > { %v981_v20 = vsub.f32 1.0, %v980_v19  ;;  %v1083_v19 = vld [vmem:[#allocation2 + $0x4] sm:$0x1] }
 0x5c0   : > { %v982_v21 = vmul.f32 %v2521_v18, %v981_v20 }
 0x5c2   : > { %v983_v22 = vadd.f32 %v2521_v18, %v982_v21 }
 0x5c4   : > { %v987_v25 = vsel %vm986_vm11, %v2521_v18, %v983_v22 }
 0x5c5   : > { %v992_v28 = vsel %vm989_vm12, %v991_v26, %v987_v25 }
 0x5c6   : > { %v1005_v36 = vsub.f32 1.0, %v992_v28  ;;  %v1011_v39 = vmul.f32 %v992_v28, %v3363_v6 }
 0x602   : > { %v996_v27 = vpop.permute.xlu2 %995 }
 0x603   : > { %v998_v29 = vmul.f32 %v996_v27, %v992_v28 }
 0x605   : > { %1000 = vrot.lane.b32.xlu0 %v998_v29, %s3006_s7 }
 0x677   : > { %v1001_v30 = vpop.permute.xlu0 %1000 }
 0x678   : > { %v1003_v31 = vadd.f32 %v1001_v30, %v953_v13 }
 0x67a   : > { %2522 = vtanh.f32 %v1003_v31 }
 0x680   : > { %v2523_v32 = vpop.eup %2522 }
 0x681   : > { %1007 = vrot.lane.b32.xlu1 %v2523_v32, %s3007_s17 }
 0x6f3   : > { %v1008_v37 = vpop.permute.xlu1 %1007 }
 0x6f4   : > { %v1010_v40 = vmul.f32 %v1008_v37, %v1005_v36 }
 0x6f6   : > { %v3380_v41 = vadd.f32 %v1011_v39, %v1010_v40 }
 0x6f8   : > { %v1019_v42 = vpack.c.bf16 %v3380_v41, %v3380_v41 }
 0x6fa   : > { %1021 = vrot.lane.b32.xlu2 %v1019_v42, %s3007_s17 }
 0x754   : > { %v1022_v43 = vpop.permute.xlu2 %1021 }
 0x755   : > { %2288 = vmatmul.msk.bf16.vlgmr.msrb.gmra.mxu1 %vm748_vm0, %v1022_v43 }
 0x7d2   : > { %v1035_v46 = vpop.f32.mrf.mxu1 }
 0x7d3   : > { %v1036_v47 = vadd.f32 %v1035_v46, %v3346_v9 }
 0x7d5   : > { %1060 = vrot.lane.b32.xlu0 %v1036_v47, %s3006_s7  ;;  %v1039_v50 = vadd.f32 %v1036_v47, %v1018_v49 }
 0x7d7   : > { %v2289_v51 = vmul.f32 -1.442695, %v1039_v50 }
 0x7d9   : > { %2524 = vpow2.f32 %v2289_v51 }
 0x7da   : > { %v1037_v48 = vpop.f32.mrf.mxu1 }
 0x7df   : > { %v2525_v52 = vpop.eup %2524 }
 0x7e0   : > { %v1043_v53 = vadd.f32 1.0, %v2525_v52 }
 0x7e2   : > { %2526 = vrcp.f32 %v1043_v53  ;;  %v1055_v59 = vand.u32 2147483648, %v1043_v53  ;;  %vm1049_vm14 = vweird.f32 %v1043_v53  ;;  %v1053_v60 = vand.u32 2147483647, %v1043_v53 }
 0x7e4   : > { %v1056_v62 = vor.u32 1.1754944e-38, %v1055_v59  ;;  %vm1054_vm1 = vcmp.eq.f32.partialorder %v1053_v60, 8.507059e+37 }
 0x7e8   : > { %v2527_v54 = vpop.eup %2526 }
 0x7e9   : > { %v1045_v55 = vmul.f32 %v2527_v54, %v1043_v53  ;;  %vm1050_vm13 = vweird.f32 %v2527_v54 }
 0x7ea   : > { %vm1051_vm15 = vmor %vm1049_vm14, %vm1050_vm13 }
 0x7eb   : > { %v1046_v56 = vsub.f32 1.0, %v1045_v55 }
 0x7ed   : > { %v1047_v57 = vmul.f32 %v2527_v54, %v1046_v56 }
 0x7ef   : > { %v1048_v58 = vadd.f32 %v2527_v54, %v1047_v57 }
 0x7f1   : > { %v1052_v61 = vsel %vm1051_vm15, %v2527_v54, %v1048_v58 }
 0x7f2   : > { %v1057_v0 = vsel %vm1054_vm1, %v1056_v62, %v1052_v61 }
 0x7f3   : > { %v1070_v8 = vsub.f32 1.0, %v1057_v0  ;;  %v1076_v11 = vmul.f32 %v1057_v0, %v3380_v41 }
 0x847   : > { %v1061_v63 = vpop.permute.xlu0 %1060 }
 0x848   : > { %v1063_v2 = vmul.f32 %v1061_v63, %v1057_v0 }
 0x84a   : > { %1065 = vrot.lane.b32.xlu1 %v1063_v2, %s3006_s7 }
 0x8bc   : > { %v1066_v4 = vpop.permute.xlu1 %1065 }
 0x8bd   : > { %v1068_v5 = vadd.f32 %v1066_v4, %v1018_v49  ;;  %v1148_v49 = vld [vmem:[#allocation2 + $0x5] sm:$0x1] }
 0x8bf   : > { %2528 = vtanh.f32 %v1068_v5 }
 0x8c5   : > { %v2529_v7 = vpop.eup %2528 }
 0x8c6   : > { %1072 = vrot.lane.b32.xlu2 %v2529_v7, %s3007_s17 }
 0x920   : > { %v1073_v10 = vpop.permute.xlu2 %1072 }
 0x921   : > { %v1075_v12 = vmul.f32 %v1073_v10, %v1070_v8 }
 0x923   : > { %v3394_v13 = vadd.f32 %v1076_v11, %v1075_v12 }
 0x925   : > { %v1084_v14 = vpack.c.bf16 %v3394_v13, %v3394_v13 }
 0x927   : > { %1086 = vrot.lane.b32.xlu0 %v1084_v14, %s3007_s17 }
 0x999   : > { %v1087_v15 = vpop.permute.xlu0 %1086 }
 0x99a   : > { %2290 = vmatmul.msk.bf16.vlgmr.msrb.gmra.mxu2 %vm748_vm0, %v1087_v15 }
 0xa1d   : > { %v1100_v16 = vpop.f32.mrf.mxu2 }
 0xa1e   : > { %v1101_v17 = vadd.f32 %v1100_v16, %v3346_v9 }
 0xa20   : > { %1125 = vrot.lane.b32.xlu1 %v1101_v17, %s3006_s7  ;;  %v1104_v20 = vadd.f32 %v1101_v17, %v1083_v19 }
 0xa22   : > { %v2291_v21 = vmul.f32 -1.442695, %v1104_v20  ;;  %v1213_v20 = vld [vmem:[#allocation2 + $0x6] sm:$0x1] }
 0xa24   : > { %2530 = vpow2.f32 %v2291_v21 }
 0xa25   : > { %v1102_v18 = vpop.f32.mrf.mxu2 }
 0xa2a   : > { %v2531_v22 = vpop.eup %2530 }
 0xa2b   : > { %v1108_v23 = vadd.f32 1.0, %v2531_v22 }
 0xa2d   : > { %2532 = vrcp.f32 %v1108_v23  ;;  %v1120_v29 = vand.u32 2147483648, %v1108_v23  ;;  %vm1114_vm3 = vweird.f32 %v1108_v23  ;;  %v1118_v30 = vand.u32 2147483647, %v1108_v23 }
 0xa2f   : > { %v1121_v32 = vor.u32 1.1754944e-38, %v1120_v29  ;;  %vm1119_vm5 = vcmp.eq.f32.partialorder %v1118_v30, 8.507059e+37 }
 0xa33   : > { %v2533_v24 = vpop.eup %2532 }
 0xa34   : > { %v1110_v25 = vmul.f32 %v2533_v24, %v1108_v23  ;;  %vm1115_vm2 = vweird.f32 %v2533_v24 }
 0xa35   : > { %vm1116_vm4 = vmor %vm1114_vm3, %vm1115_vm2 }
 0xa36   : > { %v1111_v26 = vsub.f32 1.0, %v1110_v25 }
 0xa38   : > { %v1112_v27 = vmul.f32 %v2533_v24, %v1111_v26 }
 0xa3a   : > { %v1113_v28 = vadd.f32 %v2533_v24, %v1112_v27 }
 0xa3c   : > { %v1117_v31 = vsel %vm1116_vm4, %v2533_v24, %v1113_v28 }
 0xa3d   : > { %v1122_v34 = vsel %vm1119_vm5, %v1121_v32, %v1117_v31 }
 0xa3e   : > { %v1135_v40 = vsub.f32 1.0, %v1122_v34  ;;  %v1141_v43 = vmul.f32 %v1122_v34, %v3394_v13 }
 0xa92   : > { %v1126_v33 = vpop.permute.xlu1 %1125 }
 0xa93   : > { %v1128_v35 = vmul.f32 %v1126_v33, %v1122_v34 }
 0xa95   : > { %1130 = vrot.lane.b32.xlu2 %v1128_v35, %s3006_s7 }
 0xaef   : > { %v1131_v36 = vpop.permute.xlu2 %1130 }
 0xaf0   : > { %v1133_v37 = vadd.f32 %v1131_v36, %v1083_v19 }
 0xaf2   : > { %2534 = vtanh.f32 %v1133_v37 }
 0xaf8   : > { %v2535_v39 = vpop.eup %2534 }
 0xaf9   : > { %1137 = vrot.lane.b32.xlu0 %v2535_v39, %s3007_s17 }
 0xb6b   : > { %v1138_v42 = vpop.permute.xlu0 %1137 }
 0xb6c   : > { %v1140_v1 = vmul.f32 %v1138_v42, %v1135_v40 }
 0xb6e   : > { %v3405_v3 = vadd.f32 %v1141_v43, %v1140_v1 }
 0xb70   : > { %v1149_v44 = vpack.c.bf16 %v3405_v3, %v3405_v3 }
 0xb72   : > { %1151 = vrot.lane.b32.xlu1 %v1149_v44, %s3007_s17 }
 0xbe4   : > { %v1152_v45 = vpop.permute.xlu1 %1151 }
 0xbe5   : > { %2292 = vmatmul.msk.bf16.vlgmr.msrb.gmra.mxu3 %vm748_vm0, %v1152_v45 }
 0xc68   : > { %v1165_v46 = vpop.f32.mrf.mxu3 }
 0xc69   : > { %v1166_v47 = vadd.f32 %v1165_v46, %v3346_v9 }
 0xc6b   : > { %1190 = vrot.lane.b32.xlu2 %v1166_v47, %s3006_s7  ;;  %v1169_v50 = vadd.f32 %v1166_v47, %v1148_v49 }
 0xc6d   : > { %v2293_v51 = vmul.f32 -1.442695, %v1169_v50 }
 0xc6f   : > { %2536 = vpow2.f32 %v2293_v51  ;;  %v1278_v51 = vld [vmem:[#allocation2 + $0x7] sm:$0x1] }
 0xc70   : > { %v1167_v48 = vpop.f32.mrf.mxu3 }
 0xc75   : > { %v2537_v52 = vpop.eup %2536 }
 0xc76   : > { %v1173_v53 = vadd.f32 1.0, %v2537_v52 }
 0xc78   : > { %2538 = vrcp.f32 %v1173_v53  ;;  %v1185_v59 = vand.u32 2147483648, %v1173_v53  ;;  %vm1179_vm7 = vweird.f32 %v1173_v53  ;;  %v1183_v60 = vand.u32 2147483647, %v1173_v53 }
 0xc7a   : > { %v1186_v62 = vor.u32 1.1754944e-38, %v1185_v59  ;;  %vm1184_vm9 = vcmp.eq.f32.partialorder %v1183_v60, 8.507059e+37 }
 0xc7e   : > { %v2539_v54 = vpop.eup %2538 }
 0xc7f   : > { %v1175_v55 = vmul.f32 %v2539_v54, %v1173_v53  ;;  %vm1180_vm6 = vweird.f32 %v2539_v54 }
 0xc80   : > { %vm1181_vm8 = vmor %vm1179_vm7, %vm1180_vm6 }
 0xc81   : > { %v1176_v56 = vsub.f32 1.0, %v1175_v55 }
 0xc83   : > { %v1177_v57 = vmul.f32 %v2539_v54, %v1176_v56 }
 0xc85   : > { %v1178_v58 = vadd.f32 %v2539_v54, %v1177_v57 }
 0xc87   : > { %v1182_v61 = vsel %vm1181_vm8, %v2539_v54, %v1178_v58 }
 0xc88   : > { %v1187_v0 = vsel %vm1184_vm9, %v1186_v62, %v1182_v61 }
 0xc89   : > { %v1200_v8 = vsub.f32 1.0, %v1187_v0  ;;  %v1206_v11 = vmul.f32 %v1187_v0, %v3405_v3 }
 0xcc5   : > { %v1191_v63 = vpop.permute.xlu2 %1190 }
 0xcc6   : > { %v1193_v2 = vmul.f32 %v1191_v63, %v1187_v0 }
 0xcc8   : > { %1195 = vrot.lane.b32.xlu0 %v1193_v2, %s3006_s7 }
 0xd3a   : > { %v1196_v4 = vpop.permute.xlu0 %1195 }
 0xd3b   : > { %v1198_v5 = vadd.f32 %v1196_v4, %v1148_v49 }
 0xd3d   : > { %2540 = vtanh.f32 %v1198_v5 }
 0xd43   : > { %v2541_v7 = vpop.eup %2540 }
 0xd44   : > { %1202 = vrot.lane.b32.xlu1 %v2541_v7, %s3007_s17 }
 0xdb6   : > { %v1203_v10 = vpop.permute.xlu1 %1202 }
 0xdb7   : > { %v1205_v12 = vmul.f32 %v1203_v10, %v1200_v8  ;;  %v2362_v10 = vld [vmem:[#allocation17 + $0x8] sm:$0xff] }
 0xdb8   : > { %1369 = vmatpush.bf16.msra.mxu2 %v2362_v10  ;;  %1434 = vmatpush.bf16.msra.mxu3 %v2362_v10 }
 0xdb9   : > { %v3416_v14 = vadd.f32 %v1206_v11, %v1205_v12  ;;  %v2361_v11 = vld [vmem:[#allocation17] sm:$0xff]  ;;  %1499 = vmatpush.bf16.msrb.mxu0 %v2362_v10  ;;  %1564 = vmatpush.bf16.msrb.mxu1 %v2362_v10 }
 0xdbb   : > { %v1214_v15 = vpack.c.bf16 %v3416_v14, %v3416_v14 }
 0xdbc   : > { %1370 = vmatpush.bf16.msra.mxu2 %v2361_v11  ;;  %1435 = vmatpush.bf16.msra.mxu3 %v2361_v11 }
 0xdbd   : > { %1216 = vrot.lane.b32.xlu2 %v1214_v15, %s3007_s17  ;;  %1500 = vmatpush.bf16.msrb.mxu0 %v2361_v11 }
 0xdbe   : > { %1565 = vmatpush.bf16.msrb.mxu1 %v2361_v11 }
 0xdc0   : > { %1629 = vmatpush.bf16.msrb.mxu2 %v2362_v10  ;;  %1694 = vmatpush.bf16.msrb.mxu3 %v2362_v10 }
 0xdc4   : > { %1630 = vmatpush.bf16.msrb.mxu2 %v2361_v11  ;;  %1695 = vmatpush.bf16.msrb.mxu3 %v2361_v11 }
 0xe17   : > { %v1217_v16 = vpop.permute.xlu2 %1216 }
 0xe18   : > { %2294 = vmatmul.msk.bf16.vlgmr.msra.gmra.mxu0 %vm748_vm0, %v1217_v16 }
 0xe19   : > { %1759 = vmatpush.bf16.msra.mxu0 %v2362_v10 }
 0xe1d   : > { %1760 = vmatpush.bf16.msra.mxu0 %v2361_v11 }
 0xe95   : > { %v1230_v17 = vpop.f32.mrf.mxu0 }
 0xe96   : > { %v1231_v18 = vadd.f32 %v1230_v17, %v3346_v9 }
 0xe98   : > { %1255 = vrot.lane.b32.xlu0 %v1231_v18, %s3006_s7  ;;  %v1234_v21 = vadd.f32 %v1231_v18, %v1213_v20 }
 0xe9a   : > { %v2295_v22 = vmul.f32 -1.442695, %v1234_v21  ;;  %v3447_v21 = vld [vmem:[%s3701_s16] sm:$0x1] }
 0xe9c   : > { %2542 = vpow2.f32 %v2295_v22 }
 0xe9d   : > { %v1232_v19 = vpop.f32.mrf.mxu0 }
 0xea2   : > { %v2543_v23 = vpop.eup %2542 }
 0xea3   : > { %v1238_v24 = vadd.f32 1.0, %v2543_v23 }
 0xea5   : > { %2544 = vrcp.f32 %v1238_v24  ;;  %v1250_v30 = vand.u32 2147483648, %v1238_v24  ;;  %vm1244_vm11 = vweird.f32 %v1238_v24  ;;  %v1248_v31 = vand.u32 2147483647, %v1238_v24 }
 0xea7   : > { %v1251_v33 = vor.u32 1.1754944e-38, %v1250_v30  ;;  %vm1249_vm13 = vcmp.eq.f32.partialorder %v1248_v31, 8.507059e+37 }
 0xeab   : > { %v2545_v25 = vpop.eup %2544 }
 0xeac   : > { %v1240_v26 = vmul.f32 %v2545_v25, %v1238_v24  ;;  %vm1245_vm10 = vweird.f32 %v2545_v25 }
 0xead   : > { %vm1246_vm12 = vmor %vm1244_vm11, %vm1245_vm10 }
 0xeae   : > { %v1241_v27 = vsub.f32 1.0, %v1240_v26 }
 0xeb0   : > { %v1242_v28 = vmul.f32 %v2545_v25, %v1241_v27 }
 0xeb2   : > { %v1243_v29 = vadd.f32 %v2545_v25, %v1242_v28 }
 0xeb4   : > { %v1247_v32 = vsel %vm1246_vm12, %v2545_v25, %v1243_v29  ;;  %v1343_v25 = vld [vmem:[#allocation3] sm:$0x1] }
 0xeb5   : > { %v1252_v35 = vsel %vm1249_vm13, %v1251_v33, %v1247_v32 }
 0xeb6   : > { %v1265_v42 = vsub.f32 1.0, %v1252_v35  ;;  %v1271_v1 = vmul.f32 %v1252_v35, %v3416_v14 }
 0xf0a   : > { %v1256_v34 = vpop.permute.xlu0 %1255 }
 0xf0b   : > { %v1258_v36 = vmul.f32 %v1256_v34, %v1252_v35 }
 0xf0d   : > { %1260 = vrot.lane.b32.xlu1 %v1258_v36, %s3006_s7 }
 0xf7f   : > { %v1261_v37 = vpop.permute.xlu1 %1260 }
 0xf80   : > { %v1263_v39 = vadd.f32 %v1261_v37, %v1213_v20 }
 0xf82   : > { %2546 = vtanh.f32 %v1263_v39 }
 0xf88   : > { %v2547_v40 = vpop.eup %2546 }
 0xf89   : > { %1267 = vrot.lane.b32.xlu2 %v2547_v40, %s3007_s17 }
 0xfe3   : > { %v1268_v43 = vpop.permute.xlu2 %1267 }
 0xfe4   : > { %v1270_v44 = vmul.f32 %v1268_v43, %v1265_v42 }
 0xfe6   : > { %v3427_v45 = vadd.f32 %v1271_v1, %v1270_v44 }
 0xfe8   : > { %v1279_v46 = vpack.c.bf16 %v3427_v45, %v3427_v45 }
 0xfea   : > { %1281 = vrot.lane.b32.xlu0 %v1279_v46, %s3007_s17 }
0x105c   : > { %v1282_v47 = vpop.permute.xlu0 %1281 }
0x105d   : > { %2296 = vmatmul.msk.bf16.vlgmr.msra.gmra.mxu1 %vm748_vm0, %v1282_v47 }
0x105e   : > { %1824 = vmatpush.bf16.msra.mxu1 %v2362_v10 }
0x1062   : > { %1825 = vmatpush.bf16.msra.mxu1 %v2361_v11 }
0x10da   : > { %v1295_v48 = vpop.f32.mrf.mxu1 }
0x10db   : > { %v1296_v49 = vadd.f32 %v1295_v48, %v3346_v9 }
0x10dd   : > { %1320 = vrot.lane.b32.xlu1 %v1296_v49, %s3006_s7  ;;  %v1299_v52 = vadd.f32 %v1296_v49, %v1278_v51 }
0x10df   : > { %v2297_v53 = vmul.f32 -1.442695, %v1299_v52 }
0x10e1   : > { %2548 = vpow2.f32 %v2297_v53 }
0x10e2   : > { %v1297_v50 = vpop.f32.mrf.mxu1 }
0x10e7   : > { %v2549_v54 = vpop.eup %2548 }
0x10e8   : > { %v1303_v55 = vadd.f32 1.0, %v2549_v54 }
0x10ea   : > { %2550 = vrcp.f32 %v1303_v55  ;;  %v1315_v61 = vand.u32 2147483648, %v1303_v55  ;;  %vm1309_vm15 = vweird.f32 %v1303_v55  ;;  %v1313_v62 = vand.u32 2147483647, %v1303_v55 }
0x10ec   : > { %v1316_v63 = vor.u32 1.1754944e-38, %v1315_v61  ;;  %vm1314_vm2 = vcmp.eq.f32.partialorder %v1313_v62, 8.507059e+37 }
0x10f0   : > { %v2551_v56 = vpop.eup %2550 }
0x10f1   : > { %v1305_v57 = vmul.f32 %v2551_v56, %v1303_v55  ;;  %vm1310_vm14 = vweird.f32 %v2551_v56 }
0x10f2   : > { %vm1311_vm1 = vmor %vm1309_vm15, %vm1310_vm14 }
0x10f3   : > { %v1306_v58 = vsub.f32 1.0, %v1305_v57  ;;  %v1420_v57 = vld [vmem:[#allocation3 + $0x1] sm:$0x1] }
0x10f5   : > { %v1307_v59 = vmul.f32 %v2551_v56, %v1306_v58 }
0x10f7   : > { %v1308_v60 = vadd.f32 %v2551_v56, %v1307_v59 }
0x10f9   : > { %v1312_v9 = vsel %vm1311_vm1, %v2551_v56, %v1308_v60 }
0x10fa   : > { %v1317_v2 = vsel %vm1314_vm2, %v1316_v63, %v1312_v9 }
0x10fb   : > { %v1330_v12 = vsub.f32 1.0, %v1317_v2  ;;  %v1336_v16 = vmul.f32 %v1317_v2, %v3427_v45 }
0x114f   : > { %v1321_v0 = vpop.permute.xlu1 %1320 }
0x1150   : > { %v1323_v4 = vmul.f32 %v1321_v0, %v1317_v2 }
0x1152   : > { %1325 = vrot.lane.b32.xlu2 %v1323_v4, %s3006_s7 }
0x11ac   : > { %v1326_v5 = vpop.permute.xlu2 %1325 }
0x11ad   : > { %v1328_v7 = vadd.f32 %v1326_v5, %v1278_v51 }
0x11af   : > { %2552 = vtanh.f32 %v1328_v7 }
0x11b5   : > { %v2553_v8 = vpop.eup %2552 }
0x11b6   : > { %1332 = vrot.lane.b32.xlu0 %v2553_v8, %s3007_s17 }
0x1228   : > { %v1333_v15 = vpop.permute.xlu0 %1332 }
0x1229   : > { %v1335_v17 = vmul.f32 %v1333_v15, %v1330_v12 }
0x122b   : > { %v3438_v18 = vadd.f32 %v1336_v16, %v1335_v17 }
0x122d   : > { %v1344_v19 = vpack.c.bf16 %v3438_v18, %v3438_v18 }
0x122f   : > { %1346 = vrot.lane.b32.xlu1 %v1344_v19, %s3007_s17 }
0x12a1   : > { %v1347_v20 = vpop.permute.xlu1 %1346 }
0x12a2   : > { %2306 = vmatmul.msk.bf16.vlgmr.msra.gmra.mxu2 %vm748_vm0, %v1347_v20 }
0x1325   : > { %v1372_v22 = vpop.f32.mrf.mxu2 }
0x1326   : > { %v1373_v23 = vadd.f32 %v1372_v22, %v3447_v21 }
0x1328   : > { %1397 = vrot.lane.b32.xlu2 %v1373_v23, %s3006_s7  ;;  %v1376_v26 = vadd.f32 %v1373_v23, %v1343_v25 }
0x132a   : > { %v2307_v27 = vmul.f32 -1.442695, %v1376_v26 }
0x132c   : > { %2554 = vpow2.f32 %v2307_v27 }
0x132d   : > { %v1374_v24 = vpop.f32.mrf.mxu2 }
0x1332   : > { %v2555_v28 = vpop.eup %2554 }
0x1333   : > { %v1380_v29 = vadd.f32 1.0, %v2555_v28 }
0x1335   : > { %2556 = vrcp.f32 %v1380_v29  ;;  %v1392_v35 = vand.u32 2147483648, %v1380_v29  ;;  %vm1386_vm4 = vweird.f32 %v1380_v29  ;;  %v1390_v36 = vand.u32 2147483647, %v1380_v29 }
0x1337   : > { %v1393_v39 = vor.u32 1.1754944e-38, %v1392_v35  ;;  %vm1391_vm6 = vcmp.eq.f32.partialorder %v1390_v36, 8.507059e+37 }
0x133b   : > { %v2557_v30 = vpop.eup %2556 }
0x133c   : > { %v1382_v31 = vmul.f32 %v2557_v30, %v1380_v29  ;;  %vm1387_vm3 = vweird.f32 %v2557_v30 }
0x133d   : > { %vm1388_vm5 = vmor %vm1386_vm4, %vm1387_vm3 }
0x133e   : > { %v1383_v32 = vsub.f32 1.0, %v1382_v31 }
0x1340   : > { %v1384_v33 = vmul.f32 %v2557_v30, %v1383_v32 }
0x1342   : > { %v1385_v34 = vadd.f32 %v2557_v30, %v1384_v33 }
0x1344   : > { %v1389_v37 = vsel %vm1388_vm5, %v2557_v30, %v1385_v34  ;;  %v1485_v30 = vld [vmem:[#allocation3 + $0x2] sm:$0x1] }
0x1345   : > { %v1394_v42 = vsel %vm1391_vm6, %v1393_v39, %v1389_v37 }
0x1346   : > { %v1407_v47 = vsub.f32 1.0, %v1394_v42  ;;  %v1413_v49 = vmul.f32 %v1394_v42, %v3438_v18 }
0x1382   : > { %v1398_v40 = vpop.permute.xlu2 %1397 }
0x1383   : > { %v1400_v43 = vmul.f32 %v1398_v40, %v1394_v42 }
0x1385   : > { %1402 = vrot.lane.b32.xlu0 %v1400_v43, %s3006_s7 }
0x13f7   : > { %v1403_v1 = vpop.permute.xlu0 %1402 }
0x13f8   : > { %v1405_v44 = vadd.f32 %v1403_v1, %v1343_v25 }
0x13fa   : > { %2558 = vtanh.f32 %v1405_v44 }
0x1400   : > { %v2559_v46 = vpop.eup %2558 }
0x1401   : > { %1409 = vrot.lane.b32.xlu1 %v2559_v46, %s3007_s17 }
0x1473   : > { %v1410_v48 = vpop.permute.xlu1 %1409 }
0x1474   : > { %v1412_v50 = vmul.f32 %v1410_v48, %v1407_v47 }
0x1476   : > { %v3454_v51 = vadd.f32 %v1413_v49, %v1412_v50 }
0x1478   : > { %v1421_v52 = vpack.c.bf16 %v3454_v51, %v3454_v51 }
0x147a   : > { %1423 = vrot.lane.b32.xlu2 %v1421_v52, %s3007_s17 }
0x14d4   : > { %v1424_v53 = vpop.permute.xlu2 %1423 }
0x14d5   : > { %2308 = vmatmul.msk.bf16.vlgmr.msra.gmra.mxu3 %vm748_vm0, %v1424_v53 }
0x1558   : > { %v1437_v54 = vpop.f32.mrf.mxu3 }
0x1559   : > { %v1438_v55 = vadd.f32 %v1437_v54, %v3447_v21 }
0x155b   : > { %1462 = vrot.lane.b32.xlu0 %v1438_v55, %s3006_s7  ;;  %v1441_v58 = vadd.f32 %v1438_v55, %v1420_v57 }
0x155d   : > { %v2309_v59 = vmul.f32 -1.442695, %v1441_v58 }
0x155f   : > { %2560 = vpow2.f32 %v2309_v59 }
0x1560   : > { %v1439_v56 = vpop.f32.mrf.mxu3 }
0x1565   : > { %v2561_v60 = vpop.eup %2560 }
0x1566   : > { %v1445_v61 = vadd.f32 1.0, %v2561_v60 }
0x1568   : > { %2562 = vrcp.f32 %v1445_v61  ;;  %v1457_v4 = vand.u32 2147483648, %v1445_v61  ;;  %vm1451_vm8 = vweird.f32 %v1445_v61  ;;  %v1455_v5 = vand.u32 2147483647, %v1445_v61 }
0x156a   : > { %v1458_v8 = vor.u32 1.1754944e-38, %v1457_v4  ;;  %vm1456_vm10 = vcmp.eq.f32.partialorder %v1455_v5, 8.507059e+37 }
0x156e   : > { %v2563_v62 = vpop.eup %2562 }
0x156f   : > { %v1447_v9 = vmul.f32 %v2563_v62, %v1445_v61  ;;  %vm1452_vm7 = vweird.f32 %v2563_v62 }
0x1570   : > { %vm1453_vm9 = vmor %vm1451_vm8, %vm1452_vm7 }
0x1571   : > { %v1448_v63 = vsub.f32 1.0, %v1447_v9  ;;  %v1550_v9 = vld [vmem:[#allocation3 + $0x3] sm:$0x1] }
0x1573   : > { %v1449_v0 = vmul.f32 %v2563_v62, %v1448_v63 }
0x1575   : > { %v1450_v2 = vadd.f32 %v2563_v62, %v1449_v0 }
0x1577   : > { %v1454_v7 = vsel %vm1453_vm9, %v2563_v62, %v1450_v2 }
0x1578   : > { %v1459_v11 = vsel %vm1456_vm10, %v1458_v8, %v1454_v7 }
0x1579   : > { %v1472_v19 = vsub.f32 1.0, %v1459_v11  ;;  %v1478_v22 = vmul.f32 %v1459_v11, %v3454_v51 }
0x15cd   : > { %v1463_v10 = vpop.permute.xlu0 %1462 }
0x15ce   : > { %v1465_v12 = vmul.f32 %v1463_v10, %v1459_v11 }
0x15d0   : > { %1467 = vrot.lane.b32.xlu1 %v1465_v12, %s3006_s7 }
0x1642   : > { %v1468_v15 = vpop.permute.xlu1 %1467 }
0x1643   : > { %v1470_v16 = vadd.f32 %v1468_v15, %v1420_v57 }
0x1645   : > { %2564 = vtanh.f32 %v1470_v16 }
0x164b   : > { %v2565_v17 = vpop.eup %2564 }
0x164c   : > { %1474 = vrot.lane.b32.xlu2 %v2565_v17, %s3007_s17 }
0x16a6   : > { %v1475_v20 = vpop.permute.xlu2 %1474 }
0x16a7   : > { %v1477_v23 = vmul.f32 %v1475_v20, %v1472_v19 }
0x16a9   : > { %v3465_v24 = vadd.f32 %v1478_v22, %v1477_v23 }
0x16ab   : > { %v1486_v25 = vpack.c.bf16 %v3465_v24, %v3465_v24 }
0x16ad   : > { %1488 = vrot.lane.b32.xlu0 %v1486_v25, %s3007_s17 }
0x171f   : > { %v1489_v26 = vpop.permute.xlu0 %1488 }
0x1720   : > { %2310 = vmatmul.msk.bf16.vlgmr.msrb.gmra.mxu0 %vm748_vm0, %v1489_v26 }
0x179d   : > { %v1502_v27 = vpop.f32.mrf.mxu0 }
0x179e   : > { %v1503_v28 = vadd.f32 %v1502_v27, %v3447_v21 }
0x17a0   : > { %1527 = vrot.lane.b32.xlu1 %v1503_v28, %s3006_s7  ;;  %v1506_v31 = vadd.f32 %v1503_v28, %v1485_v30 }
0x17a2   : > { %v2311_v32 = vmul.f32 -1.442695, %v1506_v31 }
0x17a4   : > { %2566 = vpow2.f32 %v2311_v32 }
0x17a5   : > { %v1504_v29 = vpop.f32.mrf.mxu0 }
0x17aa   : > { %v2567_v33 = vpop.eup %2566 }
0x17ab   : > { %v1510_v34 = vadd.f32 1.0, %v2567_v33 }
0x17ad   : > { %2568 = vrcp.f32 %v1510_v34  ;;  %v1522_v42 = vand.u32 2147483648, %v1510_v34  ;;  %vm1516_vm12 = vweird.f32 %v1510_v34  ;;  %v1520_v43 = vand.u32 2147483647, %v1510_v34 }
0x17af   : > { %v1523_v44 = vor.u32 1.1754944e-38, %v1522_v42  ;;  %vm1521_vm14 = vcmp.eq.f32.partialorder %v1520_v43, 8.507059e+37 }
0x17b3   : > { %v2569_v35 = vpop.eup %2568 }
0x17b4   : > { %v1512_v36 = vmul.f32 %v2569_v35, %v1510_v34  ;;  %vm1517_vm11 = vweird.f32 %v2569_v35 }
0x17b5   : > { %vm1518_vm13 = vmor %vm1516_vm12, %vm1517_vm11 }
0x17b6   : > { %v1513_v37 = vsub.f32 1.0, %v1512_v36 }
0x17b8   : > { %v1514_v39 = vmul.f32 %v2569_v35, %v1513_v37  ;;  %v1615_v37 = vld [vmem:[#allocation3 + $0x4] sm:$0x1] }
0x17ba   : > { %v1515_v40 = vadd.f32 %v2569_v35, %v1514_v39 }
0x17bc   : > { %v1519_v1 = vsel %vm1518_vm13, %v2569_v35, %v1515_v40 }
0x17bd   : > { %v1524_v47 = vsel %vm1521_vm14, %v1523_v44, %v1519_v1 }
0x17be   : > { %v1537_v53 = vsub.f32 1.0, %v1524_v47  ;;  %v1543_v55 = vmul.f32 %v1524_v47, %v3465_v24 }
0x1812   : > { %v1528_v46 = vpop.permute.xlu1 %1527 }
0x1813   : > { %v1530_v48 = vmul.f32 %v1528_v46, %v1524_v47 }
0x1815   : > { %1532 = vrot.lane.b32.xlu2 %v1530_v48, %s3006_s7 }
0x186f   : > { %v1533_v49 = vpop.permute.xlu2 %1532 }
0x1870   : > { %v1535_v50 = vadd.f32 %v1533_v49, %v1485_v30 }
0x1872   : > { %2570 = vtanh.f32 %v1535_v50 }
0x1878   : > { %v2571_v52 = vpop.eup %2570 }
0x1879   : > { %1539 = vrot.lane.b32.xlu0 %v2571_v52, %s3007_s17 }
0x18eb   : > { %v1540_v54 = vpop.permute.xlu0 %1539 }
0x18ec   : > { %v1542_v56 = vmul.f32 %v1540_v54, %v1537_v53 }
0x18ee   : > { %v3476_v57 = vadd.f32 %v1543_v55, %v1542_v56 }
0x18f0   : > { %v1551_v58 = vpack.c.bf16 %v3476_v57, %v3476_v57 }
0x18f2   : > { %1553 = vrot.lane.b32.xlu1 %v1551_v58, %s3007_s17 }
0x1964   : > { %v1554_v59 = vpop.permute.xlu1 %1553 }
0x1965   : > { %2312 = vmatmul.msk.bf16.vlgmr.msrb.gmra.mxu1 %vm748_vm0, %v1554_v59 }
0x19e2   : > { %v1567_v60 = vpop.f32.mrf.mxu1 }
0x19e3   : > { %v1568_v61 = vadd.f32 %v1567_v60, %v3447_v21 }
0x19e5   : > { %1592 = vrot.lane.b32.xlu2 %v1568_v61, %s3006_s7  ;;  %v1571_v63 = vadd.f32 %v1568_v61, %v1550_v9 }
0x19e7   : > { %v2313_v0 = vmul.f32 -1.442695, %v1571_v63 }
0x19e9   : > { %2572 = vpow2.f32 %v2313_v0 }
0x19ea   : > { %v1569_v62 = vpop.f32.mrf.mxu1 }
0x19ef   : > { %v2573_v2 = vpop.eup %2572 }
0x19f0   : > { %v1575_v4 = vadd.f32 1.0, %v2573_v2 }
0x19f2   : > { %2574 = vrcp.f32 %v1575_v4  ;;  %v1587_v12 = vand.u32 2147483648, %v1575_v4  ;;  %vm1581_vm1 = vweird.f32 %v1575_v4  ;;  %v1585_v15 = vand.u32 2147483647, %v1575_v4 }
0x19f4   : > { %v1588_v17 = vor.u32 1.1754944e-38, %v1587_v12  ;;  %vm1586_vm3 = vcmp.eq.f32.partialorder %v1585_v15, 8.507059e+37 }
0x19f8   : > { %v2575_v5 = vpop.eup %2574 }
0x19f9   : > { %v1577_v7 = vmul.f32 %v2575_v5, %v1575_v4  ;;  %vm1582_vm15 = vweird.f32 %v2575_v5 }
0x19fa   : > { %vm1583_vm2 = vmor %vm1581_vm1, %vm1582_vm15 }
0x19fb   : > { %v1578_v8 = vsub.f32 1.0, %v1577_v7 }
0x19fd   : > { %v1579_v10 = vmul.f32 %v2575_v5, %v1578_v8 }
0x19ff   : > { %v1580_v11 = vadd.f32 %v2575_v5, %v1579_v10  ;;  %v1680_v10 = vld [vmem:[#allocation3 + $0x5] sm:$0x1] }
0x1a01   : > { %v1584_v16 = vsel %vm1583_vm2, %v2575_v5, %v1580_v11 }
0x1a02   : > { %v1589_v20 = vsel %vm1586_vm3, %v1588_v17, %v1584_v16 }
0x1a03   : > { %v1602_v27 = vsub.f32 1.0, %v1589_v20  ;;  %v1608_v29 = vmul.f32 %v1589_v20, %v3476_v57 }
0x1a3f   : > { %v1593_v19 = vpop.permute.xlu2 %1592 }
0x1a40   : > { %v1595_v22 = vmul.f32 %v1593_v19, %v1589_v20 }
0x1a42   : > { %1597 = vrot.lane.b32.xlu0 %v1595_v22, %s3006_s7 }
0x1ab4   : > { %v1598_v23 = vpop.permute.xlu0 %1597 }
0x1ab5   : > { %v1600_v25 = vadd.f32 %v1598_v23, %v1550_v9 }
0x1ab7   : > { %2576 = vtanh.f32 %v1600_v25 }
0x1abd   : > { %v2577_v26 = vpop.eup %2576 }
0x1abe   : > { %1604 = vrot.lane.b32.xlu1 %v2577_v26, %s3007_s17 }
0x1b30   : > { %v1605_v28 = vpop.permute.xlu1 %1604 }
0x1b31   : > { %v1607_v30 = vmul.f32 %v1605_v28, %v1602_v27 }
0x1b33   : > { %v3487_v31 = vadd.f32 %v1608_v29, %v1607_v30 }
0x1b35   : > { %v1616_v32 = vpack.c.bf16 %v3487_v31, %v3487_v31 }
0x1b37   : > { %1618 = vrot.lane.b32.xlu2 %v1616_v32, %s3007_s17 }
0x1b91   : > { %v1619_v33 = vpop.permute.xlu2 %1618 }
0x1b92   : > { %2314 = vmatmul.msk.bf16.vlgmr.msrb.gmra.mxu2 %vm748_vm0, %v1619_v33 }
0x1c15   : > { %v1632_v34 = vpop.f32.mrf.mxu2 }
0x1c16   : > { %v1633_v35 = vadd.f32 %v1632_v34, %v3447_v21 }
0x1c18   : > { %1657 = vrot.lane.b32.xlu0 %v1633_v35, %s3006_s7  ;;  %v1636_v39 = vadd.f32 %v1633_v35, %v1615_v37 }
0x1c1a   : > { %v2315_v40 = vmul.f32 -1.442695, %v1636_v39 }
0x1c1c   : > { %2578 = vpow2.f32 %v2315_v40 }
0x1c1d   : > { %v1634_v36 = vpop.f32.mrf.mxu2 }
0x1c22   : > { %v2579_v42 = vpop.eup %2578 }
0x1c23   : > { %v1640_v43 = vadd.f32 1.0, %v2579_v42 }
0x1c25   : > { %2580 = vrcp.f32 %v1640_v43  ;;  %v1652_v49 = vand.u32 2147483648, %v1640_v43  ;;  %vm1646_vm5 = vweird.f32 %v1640_v43  ;;  %v1650_v50 = vand.u32 2147483647, %v1640_v43 }
0x1c27   : > { %v1653_v53 = vor.u32 1.1754944e-38, %v1652_v49  ;;  %vm1651_vm7 = vcmp.eq.f32.partialorder %v1650_v50, 8.507059e+37 }
0x1c2b   : > { %v2581_v1 = vpop.eup %2580 }
0x1c2c   : > { %v1642_v44 = vmul.f32 %v2581_v1, %v1640_v43  ;;  %vm1647_vm4 = vweird.f32 %v2581_v1 }
0x1c2d   : > { %vm1648_vm6 = vmor %vm1646_vm5, %vm1647_vm4  ;;  %vm886_vm5 = vcmask 253952  }
0x1c2e   : > { %v1643_v46 = vsub.f32 1.0, %v1642_v44 }
0x1c30   : > { %v1644_v47 = vmul.f32 %v2581_v1, %v1643_v46 }
0x1c32   : > { %v1645_v48 = vadd.f32 %v2581_v1, %v1644_v47 }
0x1c34   : > { %v1649_v52 = vsel %vm1648_vm6, %v2581_v1, %v1645_v48  ;;  %v1745_v48 = vld [vmem:[#allocation3 + $0x6] sm:$0x1]  ;;  %vm1918_vm6 = vcmask 1043456  }
0x1c35   : > { %v1654_v55 = vsel %vm1651_vm7, %v1653_v53, %v1649_v52  ;;  %vm1902_vm7 = vcmask 64512  }
0x1c36   : > { %v1667_v61 = vsub.f32 1.0, %v1654_v55  ;;  %v1673_v9 = vmul.f32 %v1654_v55, %v3487_v31 }
0x1c8a   : > { %v1658_v54 = vpop.permute.xlu0 %1657 }
0x1c8b   : > { %v1660_v56 = vmul.f32 %v1658_v54, %v1654_v55 }
0x1c8d   : > { %1662 = vrot.lane.b32.xlu1 %v1660_v56, %s3006_s7 }
0x1cff   : > { %v1663_v58 = vpop.permute.xlu1 %1662 }
0x1d00   : > { %v1665_v59 = vadd.f32 %v1663_v58, %v1615_v37 }
0x1d02   : > { %2582 = vtanh.f32 %v1665_v59 }
0x1d08   : > { %v2583_v60 = vpop.eup %2582 }
0x1d09   : > { %1669 = vrot.lane.b32.xlu2 %v2583_v60, %s3007_s17 }
0x1d63   : > { %v1670_v62 = vpop.permute.xlu2 %1669 }
0x1d64   : > { %v1672_v63 = vmul.f32 %v1670_v62, %v1667_v61 }
0x1d66   : > { %v3498_v0 = vadd.f32 %v1673_v9, %v1672_v63 }
0x1d68   : > { %v1681_v2 = vpack.c.bf16 %v3498_v0, %v3498_v0 }
0x1d6a   : > { %1683 = vrot.lane.b32.xlu0 %v1681_v2, %s3007_s17 }
0x1ddc   : > { %v1684_v4 = vpop.permute.xlu0 %1683 }
0x1ddd   : > { %2316 = vmatmul.msk.bf16.vlgmr.msrb.gmra.mxu3 %vm748_vm0, %v1684_v4 }
0x1e60   : > { %v1697_v5 = vpop.f32.mrf.mxu3 }
0x1e61   : > { %v1698_v7 = vadd.f32 %v1697_v5, %v3447_v21 }
0x1e63   : > { %1722 = vrot.lane.b32.xlu1 %v1698_v7, %s3006_s7  ;;  %v1701_v11 = vadd.f32 %v1698_v7, %v1680_v10 }
0x1e65   : > { %v2317_v12 = vmul.f32 -1.442695, %v1701_v11 }
0x1e67   : > { %2584 = vpow2.f32 %v2317_v12 }
0x1e68   : > { %v1699_v8 = vpop.f32.mrf.mxu3 }
0x1e6d   : > { %v2585_v15 = vpop.eup %2584 }
0x1e6e   : > { %v1705_v16 = vadd.f32 1.0, %v2585_v15 }
0x1e70   : > { %2586 = vrcp.f32 %v1705_v16  ;;  %v1717_v25 = vand.u32 2147483648, %v1705_v16  ;;  %vm1711_vm9 = vweird.f32 %v1705_v16  ;;  %v1715_v26 = vand.u32 2147483647, %v1705_v16 }
0x1e72   : > { %v1718_v28 = vor.u32 1.1754944e-38, %v1717_v25  ;;  %vm1716_vm11 = vcmp.eq.f32.partialorder %v1715_v26, 8.507059e+37  ;;  %v1810_v25 = vld [vmem:[#allocation3 + $0x7] sm:$0x1] }
0x1e76   : > { %v2587_v17 = vpop.eup %2586 }
0x1e77   : > { %v1707_v19 = vmul.f32 %v2587_v17, %v1705_v16  ;;  %vm1712_vm8 = vweird.f32 %v2587_v17 }
0x1e78   : > { %vm1713_vm10 = vmor %vm1711_vm9, %vm1712_vm8 }
0x1e79   : > { %v1708_v20 = vsub.f32 1.0, %v1707_v19 }
0x1e7b   : > { %v1709_v22 = vmul.f32 %v2587_v17, %v1708_v20 }
0x1e7d   : > { %v1710_v23 = vadd.f32 %v2587_v17, %v1709_v22 }
0x1e7f   : > { %v1714_v27 = vsel %vm1713_vm10, %v2587_v17, %v1710_v23 }
0x1e80   : > { %v1719_v30 = vsel %vm1716_vm11, %v1718_v28, %v1714_v27 }
0x1e81   : > { %v1732_v36 = vsub.f32 1.0, %v1719_v30  ;;  %v1738_v39 = vmul.f32 %v1719_v30, %v3498_v0 }
0x1ed5   : > { %v1723_v29 = vpop.permute.xlu1 %1722 }
0x1ed6   : > { %v1725_v32 = vmul.f32 %v1723_v29, %v1719_v30 }
0x1ed8   : > { %1727 = vrot.lane.b32.xlu2 %v1725_v32, %s3006_s7 }
0x1f32   : > { %v1728_v33 = vpop.permute.xlu2 %1727 }
0x1f33   : > { %v1730_v34 = vadd.f32 %v1728_v33, %v1680_v10 }
0x1f35   : > { %2588 = vtanh.f32 %v1730_v34 }
0x1f3b   : > { %v2589_v35 = vpop.eup %2588 }
0x1f3c   : > { %1734 = vrot.lane.b32.xlu0 %v2589_v35, %s3007_s17 }
0x1fae   : > { %v1735_v37 = vpop.permute.xlu0 %1734 }
0x1faf   : > { %v1737_v40 = vmul.f32 %v1735_v37, %v1732_v36 }
0x1fb1   : > { %v3509_v42 = vadd.f32 %v1738_v39, %v1737_v40 }
0x1fb3   : > { %v1746_v43 = vpack.c.bf16 %v3509_v42, %v3509_v42 }
0x1fb5   : > { %1748 = vrot.lane.b32.xlu1 %v1746_v43, %s3007_s17 }
0x2027   : > { %v1749_v1 = vpop.permute.xlu1 %1748 }
0x2028   : > { %2318 = vmatmul.msk.bf16.vlgmr.msra.gmra.mxu0 %vm748_vm0, %v1749_v1 }
0x20a5   : > { %v1762_v44 = vpop.f32.mrf.mxu0 }
0x20a6   : > { %v1763_v46 = vadd.f32 %v1762_v44, %v3447_v21 }
0x20a8   : > { %1787 = vrot.lane.b32.xlu2 %v1763_v46, %s3006_s7  ;;  %v1766_v49 = vadd.f32 %v1763_v46, %v1745_v48 }
0x20aa   : > { %v2319_v50 = vmul.f32 -1.442695, %v1766_v49 }
0x20ac   : > { %2590 = vpow2.f32 %v2319_v50 }
0x20ad   : > { %v1764_v47 = vpop.f32.mrf.mxu0 }
0x20b2   : > { %v2591_v52 = vpop.eup %2590 }
0x20b3   : > { %v1770_v53 = vadd.f32 1.0, %v2591_v52 }
0x20b5   : > { %2592 = vrcp.f32 %v1770_v53  ;;  %v1782_v60 = vand.u32 2147483648, %v1770_v53  ;;  %vm1776_vm13 = vweird.f32 %v1770_v53  ;;  %v1780_v61 = vand.u32 2147483647, %v1770_v53 }
0x20b7   : > { %v1783_v9 = vor.u32 1.1754944e-38, %v1782_v60  ;;  %vm1781_vm15 = vcmp.eq.f32.partialorder %v1780_v61, 8.507059e+37  ;;  %v2366_v60 = vld [vmem:[#allocation20 + $0x8] sm:$0xff]  ;;  %v2365_v61 = vld [vmem:[#allocation20] sm:$0xff] }
0x20b8   : > { %1961 = vmatpush.bf16.msrb.mxu0 %v2366_v60 }
0x20bb   : > { %v2593_v54 = vpop.eup %2592 }
0x20bc   : > { %v1772_v55 = vmul.f32 %v2593_v54, %v1770_v53  ;;  %vm1777_vm12 = vweird.f32 %v2593_v54  ;;  %1962 = vmatpush.bf16.msrb.mxu0 %v2365_v61 }
0x20bd   : > { %vm1778_vm14 = vmor %vm1776_vm13, %vm1777_vm12 }
0x20be   : > { %v1773_v56 = vsub.f32 1.0, %v1772_v55 }
0x20c0   : > { %v1774_v58 = vmul.f32 %v2593_v54, %v1773_v56 }
0x20c2   : > { %v1775_v59 = vadd.f32 %v2593_v54, %v1774_v58 }
0x20c4   : > { %v1779_v62 = vsel %vm1778_vm14, %v2593_v54, %v1775_v59 }
0x20c5   : > { %v1784_v2 = vsel %vm1781_vm15, %v1783_v9, %v1779_v62 }
0x20c6   : > { %v1797_v10 = vsub.f32 1.0, %v1784_v2  ;;  %v1803_v12 = vmul.f32 %v1784_v2, %v3509_v42 }
0x2102   : > { %v1788_v63 = vpop.permute.xlu2 %1787 }
0x2103   : > { %v1790_v4 = vmul.f32 %v1788_v63, %v1784_v2 }
0x2105   : > { %1792 = vrot.lane.b32.xlu0 %v1790_v4, %s3006_s7  ;;  %v2503_v4 = vld [vmem:[%s632_s1] ss:$0 sm:$0xff]  ;;  %s3703_s1 = sld [smem:[#allocation47_spill]] }
0x210b   : > { %s2051_s0 = scalar_lea.hbm %s3703_s1, %s2352_s10  ;;  %s2928_s15 = scalar_lea.hbm %s3703_s1, 16 }
0x210c   : > { %s2055_s25 = sshll.u32 %s2051_s0, 4  ;;  %s2056_s25 = int_to_ptr.hbm [resolvable:$true] %s2055_s25 }
0x210d   : > { %s2922_s28 = sshra.s32 %s2056_s25, 4  ;;  %s2923_s28 = int_to_ptr.hbm [resolvable:$true] %s2922_s28 }
0x210e   : > { %s2924_s26 = scalar_lea.hbm %s2923_s28, 8  ;;  %p2929_p12 = scmp.lt.s32.totalorder %s2923_s28, %s3703_s1 }
0x210f   : > { %p2925_p10 = scmp.ne.s32.totalorder %s2923_s28, %s2924_s26  ;;  %p2930_p3 = scmp.lt.s32.totalorder %s2928_s15, %s2924_s26 }
0x2111   : > { %p2926_p6 = pnand %p2925_p10, %p3178_p0  ;;  %p2931_p8 = por %p2930_p3, %p2929_p12 }
0x2113   : > { %p2927_p11 = pneg %p2926_p6 }
0x2115   : > { %p2932_p9 = pnand %p2931_p8, %p2927_p11 }
0x2177   : > { %v1793_v5 = vpop.permute.xlu0 %1792 }
0x2178   : > { %v1795_v7 = vadd.f32 %v1793_v5, %v1745_v48 }
0x217a   : > { %2594 = vtanh.f32 %v1795_v7 }
0x2180   : > { %v2595_v8 = vpop.eup %2594 }
0x2181   : > { %1799 = vrot.lane.b32.xlu1 %v2595_v8, %s3007_s17 }
0x21f3   : > { %v1800_v11 = vpop.permute.xlu1 %1799 }
0x21f4   : > { %v1802_v15 = vmul.f32 %v1800_v11, %v1797_v10 }
0x21f6   : > { %v3520_v16 = vadd.f32 %v1803_v12, %v1802_v15 }
0x21f8   : > { %v1811_v17 = vpack.c.bf16 %v3520_v16, %v3520_v16 }
0x21fa   : > { %1813 = vrot.lane.b32.xlu2 %v1811_v17, %s3007_s17 }
0x2254   : > { %v1814_v19 = vpop.permute.xlu2 %1813 }
0x2255   : > { %2320 = vmatmul.msk.bf16.vlgmr.msra.gmra.mxu1 %vm748_vm0, %v1814_v19 }
0x22d2   : > { %v1827_v20 = vpop.f32.mrf.mxu1 }
0x22d3   : > { %v1828_v22 = vadd.f32 %v1827_v20, %v3447_v21  ;;  %v2364_v20 = vld [vmem:[#allocation18 + $0x8] sm:$0xff] }
0x22d4   : > { %1989 = vmatpush.bf16.msrb.mxu1 %v2364_v20 }
0x22d5   : > { %1852 = vrot.lane.b32.xlu0 %v1828_v22, %s3006_s7  ;;  %v1831_v21 = vadd.f32 %v1828_v22, %v1810_v25  ;;  %v2363_v22 = vld [vmem:[#allocation18] sm:$0xff] }
0x22d7   : > { %v2321_v26 = vmul.f32 -1.442695, %v1831_v21 }
0x22d8   : > { %1990 = vmatpush.bf16.msrb.mxu1 %v2363_v22 }
0x22d9   : > { %2596 = vpow2.f32 %v2321_v26 }
0x22da   : > { %v1829_v23 = vpop.f32.mrf.mxu1 }
0x22dd   : > { %883 = vrot.lane.b32.xlu0 %v3352_v38, %s3007_s17 }
0x22df   : > { %v2597_v27 = vpop.eup %2596 }
0x22e0   : > { %v1835_v28 = vadd.f32 1.0, %v2597_v27  ;;  %v2368_v27 = vld [vmem:[#allocation21 + $0x8] sm:$0xff] }
0x22e2   : > { %2598 = vrcp.f32 %v1835_v28  ;;  %vm1841_vm2 = vweird.f32 %v1835_v28  ;;  %v1845_v33 = vand.u32 2147483647, %v1835_v28 }
0x22e4   : > { %vm1846_vm4 = vcmp.eq.f32.partialorder %v1845_v33, 8.507059e+37 }
0x22e5   : > { %1079 = vrot.lane.b32.xlu0 %v3394_v13, %s3007_s17 }
0x22e8   : > { %v2599_v38 = vpop.eup %2598 }
0x22e9   : > { %v1837_v29 = vmul.f32 %v2599_v38, %v1835_v28  ;;  %vm1842_vm1 = vweird.f32 %v2599_v38 }
0x22ea   : > { %vm1843_vm3 = vmor %vm1841_vm2, %vm1842_vm1 }
0x22eb   : > { %v1838_v30 = vsub.f32 1.0, %v1837_v29 }
0x22ed   : > { %1274 = vrot.lane.b32.xlu0 %v3427_v45, %s3007_s17  ;;  %v1839_v13 = vmul.f32 %v2599_v38, %v1838_v30  ;;  %v1847_v45 = vand.u32 2147483648, %v1835_v28  ;;  %v2367_v30 = vld [vmem:[#allocation21] sm:$0xff] }
0x22ef   : > { %v1840_v32 = vadd.f32 %v2599_v38, %v1839_v13  ;;  %v1848_v34 = vor.u32 1.1754944e-38, %v1847_v45  ;;  %v2504_v13 = vld [vmem:[%s3702_s9] ss:$0 sm:$0xff] }
0x22f5   : > { %1481 = vrot.lane.b32.xlu0 %v3465_v24, %s3007_s17  ;;  %v1844_v24 = vsel %vm1843_vm3, %v2599_v38, %v1840_v32 }
0x22f6   : > { %v1849_v35 = vsel %vm1846_vm4, %v1848_v34, %v1844_v24 }
0x22f7   : > { %v1868_v49 = vmul.f32 %v1849_v35, %v3520_v16 }
0x22fd   : > { %1676 = vrot.lane.b32.xlu0 %v3498_v0, %s3007_s17 }
0x2347   : > { %v1853_v0 = vpop.permute.xlu0 %1852 }
0x2348   : > { %v1855_v36 = vmul.f32 %v1853_v0, %v1849_v35 }
0x234a   : > { %1857 = vrot.lane.b32.xlu1 %v1855_v36, %s3006_s7  ;;  %s3705_s7 = sld [smem:[#allocation46_spill]] }
0x234f   : > { %v884_v37 = vpop.permute.xlu0 %883 }
0x2350   : > { %887 = vst.msk [vmem:[#allocation4] sm:$0x1] %vm886_vm5, %v884_v37 }
0x2352   : > { %949 = vrot.lane.b32.xlu1 %v3363_v6, %s3007_s17 }
0x2357   : > { %v1080_v39 = vpop.permute.xlu0 %1079 }
0x2358   : > { %1082 = vst.msk [vmem:[#allocation4 + $0x3] sm:$0x1] %vm886_vm5, %v1080_v39 }
0x235a   : > { %1144 = vrot.lane.b32.xlu1 %v3405_v3, %s3007_s17 }
0x235f   : > { %v1275_v40 = vpop.permute.xlu0 %1274 }
0x2360   : > { %1277 = vst.msk [vmem:[#allocation4 + $0x6] sm:$0x1] %vm886_vm5, %v1275_v40 }
0x2362   : > { %1339 = vrot.lane.b32.xlu1 %v3438_v18, %s3007_s17 }
0x2367   : > { %v1482_v43 = vpop.permute.xlu0 %1481 }
0x2368   : > { %1484 = vst.msk [vmem:[#allocation5 + $0x1] sm:$0x1] %vm886_vm5, %v1482_v43 }
0x236a   : > { %1546 = vrot.lane.b32.xlu1 %v3476_v57, %s3007_s17 }
0x236f   : > { %v1677_v1 = vpop.permute.xlu0 %1676 }
0x2370   : > { %1679 = vst.msk [vmem:[#allocation5 + $0x4] sm:$0x1] %vm886_vm5, %v1677_v1 }
0x2372   : > { %1741 = vrot.lane.b32.xlu1 %v3509_v42, %s3007_s17 }
0x23bc   : > { %v1858_v6 = vpop.permute.xlu1 %1857 }
0x23bd   : > { %v1860_v3 = vadd.f32 %v1858_v6, %v1810_v25 }
0x23bf   : > { %2600 = vtanh.f32 %v1860_v3 }
0x23c4   : > { %v950_v44 = vpop.permute.xlu1 %949 }
0x23c5   : > { %v2601_v46 = vpop.eup %2600  ;;  %952 = vst.msk [vmem:[#allocation4 + $0x1] sm:$0x1] %vm886_vm5, %v950_v44 }
0x23c6   : > { %1864 = vrot.lane.b32.xlu2 %v2601_v46, %s3007_s17 }
0x23cc   : > { %v1145_v18 = vpop.permute.xlu1 %1144 }
0x23cd   : > { %1147 = vst.msk [vmem:[#allocation4 + $0x4] sm:$0x1] %vm886_vm5, %v1145_v18 }
0x23ce   : > { %1014 = vrot.lane.b32.xlu2 %v3380_v41, %s3007_s17  ;;  %v1862_v41 = vsub.f32 1.0, %v1849_v35  ;;  %v2505_v35 = vld [vmem:[%s3705_s7] ss:$0 sm:$0xff] }
0x23d4   : > { %v1340_v57 = vpop.permute.xlu1 %1339 }
0x23d5   : > { %1342 = vst.msk [vmem:[#allocation4 + $0x7] sm:$0x1] %vm886_vm5, %v1340_v57 }
0x23d6   : > { %1209 = vrot.lane.b32.xlu2 %v3416_v14, %s3007_s17 }
0x23dc   : > { %v1547_v42 = vpop.permute.xlu1 %1546 }
0x23dd   : > { %1549 = vst.msk [vmem:[#allocation5 + $0x2] sm:$0x1] %vm886_vm5, %v1547_v42 }
0x23de   : > { %1416 = vrot.lane.b32.xlu2 %v3454_v51, %s3007_s17 }
0x23e4   : > { %v1742_v47 = vpop.permute.xlu1 %1741 }
0x23e5   : > { %1744 = vst.msk [vmem:[#allocation5 + $0x5] sm:$0x1] %vm886_vm5, %v1742_v47 }
0x23e6   : > { %1611 = vrot.lane.b32.xlu2 %v3487_v31, %s3007_s17 }
0x23ee   : > { %1806 = vrot.lane.b32.xlu2 %v3520_v16, %s3007_s17 }
0x2420   : > { %v1865_v48 = vpop.permute.xlu2 %1864 }
0x2421   : > { %v1867_v14 = vmul.f32 %v1865_v48, %v1862_v41 }
0x2423   : > { %v1869_v50 = vadd.f32 %v1868_v49, %v1867_v14 }
0x2425   : > { %1871 = vrot.lane.b32.xlu0 %v1869_v50, %s3007_s17  ;;  %s725_s17 = scalar_lea.vmem [#allocation23], %s2256_s13 }
0x2426   : > { %s2053_s11 = sshll.u32 %s725_s17, 4  ;;  %s2054_s11 = int_to_ptr.vmem [resolvable:$true] %s2053_s11 }
0x2428   : > { %v1015_v52 = vpop.permute.xlu2 %1014 }
0x2429   : > { %1017 = vst.msk [vmem:[#allocation4 + $0x2] sm:$0x1] %vm886_vm5, %v1015_v52 }
0x2430   : > { %v1210_v51 = vpop.permute.xlu2 %1209 }
0x2431   : > { %1212 = vst.msk [vmem:[#allocation4 + $0x5] sm:$0x1] %vm886_vm5, %v1210_v51 }
0x2438   : > { %v1417_v53 = vpop.permute.xlu2 %1416  ;;  %v1875_v54 = vld [vmem:[#allocation4] sm:$0xff] }
0x2439   : > { %1419 = vst.msk [vmem:[#allocation5] sm:$0x1] %vm886_vm5, %v1417_v53  ;;  %v1876_v31 = vpack.c.bf16 %v1875_v54, %v1875_v54 }
0x243b   : > { %v1887_v55 = vsel %vm748_vm0, %v1876_v31, 0  ;;  %v1919_v56 = vsel %vm1918_vm6, %v1876_v31, 0 }
0x243c   : > { %1896 = vmatpush.bf16.xpose.msra.mxu2 %v1887_v55  ;;  %1928 = vmatpush.bf16.msra.mxu3 %v1919_v56 }
0x2440   : > { %v1612_v58 = vpop.permute.xlu2 %1611 }
0x2441   : > { %1614 = vst.msk [vmem:[#allocation5 + $0x3] sm:$0x1] %vm886_vm5, %v1612_v58 }
0x2444   : > { %2032 = vmatpush.bf16.msrb.mxu2 %v2368_v27 }
0x2448   : > { %v1807_v59 = vpop.permute.xlu2 %1806  ;;  %2033 = vmatpush.bf16.msrb.mxu2 %v2367_v30 }
0x2449   : > { %1809 = vst.msk [vmem:[#allocation5 + $0x6] sm:$0x1] %vm886_vm5, %v1807_v59 }
0x2497   : > { %v1872_v62 = vpop.permute.xlu0 %1871 }
0x2498   : > { %1874 = vst.msk [vmem:[#allocation5 + $0x7] sm:$0x1] %vm886_vm5, %v1872_v62 }
0x249f   : > { %v1877_v9 = vld [vmem:[#allocation5] sm:$0xff] }
0x24a0   : > { %v1878_v63 = vpack.c.bf16 %v1877_v9, %v1877_v9 }
0x24a2   : > { %2322 = vmatmul.msk.bf16.vlgmr.msra.gmra.mxu2 %vm748_vm0, %v1878_v63  ;;  %2332 = vmatmul.msk.bf16.vlgmr.msrb.gmra.mxu0 %vm748_vm0, %v1878_v63 }
0x251f   : > { %v1964_v2 = vpop.f32.mrf.mxu0 }
0x2525   : > { %v1898_v5 = vpop.f32.mrf.mxu2 }
0x2526   : > { %v1899_v7 = vadd.f32 %v2503_v4, %v1898_v5 }
0x2527   : > { %v1966_v8 = vpop.f32.mrf.mxu0 }
0x2528   : > { %v1903_v10 = vsel %vm1902_vm7, %v1899_v7, -inf }
0x2529   : > { %1904 = vmax.xlane.f32.xlu1 %v1903_v10 }
0x252d   : > { %v1900_v11 = vpop.f32.mrf.mxu2 }
0x259c   : > { %v1905_v12 = vpop.xlane.xlu1 %1904 }
0x259d   : > { %v1906_v15 = vsub.f32 %v1899_v7, %v1905_v12 }
0x259f   : > { %v1907_v16 = vmul.f32 1.442695, %v1906_v15 }
0x25a1   : > { %2602 = vpow2.f32 %v1907_v16 }
0x25a7   : > { %v2603_v17 = vpop.eup %2602 }
0x25a8   : > { %v1909_v19 = vsel %vm1902_vm7, %v2603_v17, 0.0 }
0x25a9   : > { %1910 = vadd.xlane.f32.xlu2 %v1909_v19 }
0x261c   : > { %v1911_v23 = vpop.xlane.xlu2 %1910 }
0x261d   : > { %2604 = vrcp.f32 %v1911_v23 }
0x2623   : > { %v2605_v25 = vpop.eup %2604 }
0x2624   : > { %v1913_v21 = vmul.f32 %v2605_v25, %v2603_v17 }
0x2626   : > { %v1914_v26 = vpack.c.bf16 %v1913_v21, %v1913_v21 }
0x2628   : > { %2323 = vmatmul.msk.bf16.vlgmr.msra.gmra.mxu3 %vm1902_vm7, %v1914_v26 }
0x26ab   : > { %v1930_v28 = vpop.f32.mrf.mxu3 }
0x26ac   : > { %v1934_v38 = vpack.c.bf16 %v1930_v28, %v1930_v28 }
0x26ae   : > { %2341 = vmatmul.msk.bf16.vlgmr.msrb.gmra.mxu1 %vm748_vm0, %v1934_v38 }
0x26b3   : > { %v1932_v29 = vpop.f32.mrf.mxu3 }
0x272b   : > { %v1992_v32 = vpop.f32.mrf.mxu1 }
0x272c   : > { %v1993_v45 = vadd.f32 %v1992_v32, %v1964_v2 }
0x272e   : > { %v2000_v33 = vadd.f32 %v2504_v13, %v1993_v45 }
0x2730   : > { %2606 = vtanh.f32 %v2000_v33 }
0x2733   : > { %v1994_v24 = vpop.f32.mrf.mxu1 }
0x2736   : > { %v2607_v34 = vpop.eup %2606 }
0x2737   : > { %v2002_v0 = vpack.c.bf16 %v2607_v34, %v2607_v34 }
0x2739   : > { %2350 = vmatmul.msk.bf16.vlgmr.msrb.gmra.mxu2 %vm748_vm0, %v2002_v0 }
0x27bc   : > { %v2035_v36 = vpop.f32.mrf.mxu2 }
0x27bd   : > { %v2036_v37 = vadd.f32 %v2505_v35, %v2035_v36 }
0x27bf   : > { %2039 = vst [vmem:[%s725_s17] sm:$0xff] %v2036_v37 }
0x27c0   : > { %2935 = shalt.err (!%p2932_p9)
}
0x27c1   : > { %2403 = dma.vmem_to_hbm [thread:$0]  (%p3178_p0), %s2054_s11, 128, %s2056_s25, %s2041_s20  }
0x27c4   : > { %v2037_v39 = vpop.f32.mrf.mxu2 }
0x27c5 PF: > { %s3706_s3 = sld [smem:[#allocation31_spill]]  ;;  %p3708_p2 = scmp.ge.s32.totalorder %s2994_s24, 2 }
0x27c7   : > { %p2438_p4 = pnand %p3708_p2, %p3186_p5 }
0x27c9   : > { %p2439_p1 = pneg %p2438_p4 }
0x27cb   : > { %s2067_s13 = sand.u32 1, %s3706_s3  }
0x27cc   : > { %s2068_s18 = scalar_lea.sflag [#allocation8], %s2067_s13 }
0x27cd   : > { %2977 = dma.done.wait (%p2439_p1), %s2068_s18, 128  }
0x27ce   : > { %2979 = vsyncadd (%p2439_p1), %s2068_s18, 4294967168  ;;  %s3709_s24 = sld [smem:[#allocation33_spill]]  ;;  %s3712_s21 = smov %s2986_s22 }
0x27cf   : > { %s3710_s29 = sld [smem:[#allocation32_spill]] }
0x27d0   : > { %s3711_s23 = sld [smem:[#allocation34_spill]] }
0x27d4   : > { %p36_p13 = scmp.ge.s32.totalorder %s3709_s24, 4  }
0x27d5   : > { %s3713_s22 = smov %s3710_s29 }
0x27d6   :  { %38 = sbr.rel (!%p36_p13) target bundleno = 23 (0x17), region = 181 }
0x27db   :  { %2074 = vsyncpa [#allocation7], 1 }
0x27dc   :  { %2076 = vsyncpa [#allocation7 + $0x1], 1 }
0x27dd   :  { %2077 = vsyncpa [#allocation10], 1 }
0x27de   :  { %2079 = vsyncpa [#allocation10 + $0x1], 1 }
0x27df   :  { %2080 = vsyncpa [#allocation13], 1 }
0x27e0   :  { %2081 = vsyncpa [#allocation16], 1 }
0x27e1   :  { %2082 = vsyncpa [#allocation19], 1 }
0x27e2   :  { %2083 = vsyncpa [#allocation22], 1 }
0x27e3   :  { %2084 = vsyncpa [#allocation8], 1 }
0x27e4   :  { %2086 = vsyncpa [#allocation8 + $0x1], 1 }

</bundles_post_ra>
